<compile_context>
chip_gen: v6e
topology: v6e:2x2x1
jax: 0.10.0
libtpu: 0.0.40
codegen_flags: <defaults>
</compile_context>

<pallas_src>
import jax
import jax.numpy as jnp
from jax import lax
from jax.experimental import pallas as pl
from jax.experimental.pallas import tpu as pltpu

# ---------------- model config (small, consistent with the module) ------------
DIM = 32          # hidden size
HEADS = 2
DIM_HEAD = 16
INNER = HEADS * DIM_HEAD      # 32  (attention inner dim)
MLP_MULT = 4
FF_INNER = DIM * MLP_MULT     # 128 (feed-forward inner dim)
DEPTH = 2
NUM_TOKENS = 64
EPS = 1e-6
SCALE = DIM_HEAD ** (-0.5)
MASK_VALUE = -float(jnp.finfo(jnp.float32).max)

BATCH = 2
SEQ = 8           # decoder sequence length N
CTX_SEQ = 16      # cross-attention context length M

WEIGHTS_PER_LAYER = 10  # sa_{q,k,v,o}, ca_{q,k,v,o}, ff_{wi,wo}


# ---------------- fused Pallas kernel ------------------------------------------
def t5_decoder_kernel(x_ref, ctx_ref, *rest):
    """Fused T5Decoder forward for one batch element.

    x_ref:   (1, N, D) embedded tokens
    ctx_ref: (1, M, D) cross-attention context
    rest:    DEPTH*10 weight refs, final-LN weight ref, output ref (last).
    """
    o_ref = rest[-1]
    ln_w_ref = rest[-2]
    weight_refs = rest[:-2]

    x = x_ref[0]          # (N, D)
    ctx = ctx_ref[0]      # (M, D)
    n = x.shape[0]

    # causal mask: strictly-upper-triangular True entries get MASK_VALUE
    row = lax.broadcasted_iota(jnp.int32, (n, n), 0)
    col = lax.broadcasted_iota(jnp.int32, (n, n), 1)
    causal_mask = col > row

    def attention(xq, kv, wq_ref, wk_ref, wv_ref, wo_ref, mask):
        q = jnp.dot(xq, wq_ref[...], preferred_element_type=jnp.float32) * SCALE
        k = jnp.dot(kv, wk_ref[...], preferred_element_type=jnp.float32)
        v = jnp.dot(kv, wv_ref[...], preferred_element_type=jnp.float32)
        y = jnp.zeros((xq.shape[0], DIM), jnp.float32)
        for h in range(HEADS):             # HEADS=2, static unroll
            lo, hi = h * DIM_HEAD, (h + 1) * DIM_HEAD
            qh = q[:, lo:hi]               # (i, d)
            kh = k[:, lo:hi]               # (j, d)
            vh = v[:, lo:hi]               # (j, d)
            # contract on the head dim; no explicit transpose of kh.
            sim = lax.dot_general(qh, kh, (((1,), (1,)), ((), ())),
                                  preferred_element_type=jnp.float32)  # (i, j)
            if mask is not None:
                sim = jnp.where(mask, MASK_VALUE, sim)
            sim = sim - jnp.max(sim, axis=-1, keepdims=True)
            p = jnp.exp(sim)
            inv = pl.reciprocal(jnp.sum(p, axis=-1, keepdims=True), approx=True)
            attn = p * inv
            oh = jnp.dot(attn, vh, preferred_element_type=jnp.float32)  # (i, d)
            # fold the output projection per head -> no lane-axis concat.
            y = y + jnp.dot(oh, wo_ref[lo:hi, :],
                            preferred_element_type=jnp.float32)
        return y

    for layer in range(DEPTH):
        (sa_wq, sa_wk, sa_wv, sa_wo,
         ca_wq, ca_wk, ca_wv, ca_wo,
         ff_wi, ff_wo) = weight_refs[layer * WEIGHTS_PER_LAYER:
                                     (layer + 1) * WEIGHTS_PER_LAYER]

        # causal self-attention + residual (relative_attn_bias unused in fwd)
        x = attention(x, x, sa_wq, sa_wk, sa_wv, sa_wo, causal_mask) + x
        # cross-attention over context + residual
        x = attention(x, ctx, ca_wq, ca_wk, ca_wv, ca_wo, None) + x
        # feed-forward (wi -> ReLU -> wo, dropout=0) + residual
        hdn = jnp.maximum(
            jnp.dot(x, ff_wi[...], preferred_element_type=jnp.float32), 0.0)
        x = jnp.dot(hdn, ff_wo[...], preferred_element_type=jnp.float32) + x

    # final T5LayerNorm (RMS norm: no mean subtraction, no bias)
    var = jnp.mean(x * x, axis=-1, keepdims=True)
    o_ref[0] = ln_w_ref[...] * (x * lax.rsqrt(var + EPS))


# ---------------- pallas_call wrapper -------------------------------------------
def _resident_spec(shape):
    """Full-array block with a constant block index -> DMA'd once, stays resident."""
    nd = len(shape)
    return pl.BlockSpec(shape, lambda b, _nd=nd: (0,) * _nd)


def t5_decoder_forward(token_ids, context, params):
    # Embedding lookup is gather "glue"; all matmul/softmax/norm work runs in
    # one fused pallas_call covering every layer + final layernorm.
    # TODO(synk): gather could move in-kernel via PrefetchScalarGridSpec.
    x = jnp.take(params["embed"], token_ids, axis=0).astype(jnp.float32)  # (B,N,D)
    B, N, D = x.shape
    M = context.shape[1]

    flat_weights, w_specs = [], []
    for layer in params["layers"]:
        for name in ("sa_wq", "sa_wk", "sa_wv", "sa_wo",
                     "ca_wq", "ca_wk", "ca_wv", "ca_wo",
                     "ff_wi", "ff_wo"):
            w = layer[name]
            flat_weights.append(w)
            w_specs.append(_resident_spec(w.shape))

    in_specs = ([pl.BlockSpec((1, N, D), lambda b: (b, 0, 0)),
                 pl.BlockSpec((1, M, D), lambda b: (b, 0, 0))]
                + w_specs
                + [_resident_spec(params["ln_w"].shape)])

    return pl.pallas_call(
        t5_decoder_kernel,
        out_shape=jax.ShapeDtypeStruct((B, N, D), jnp.float32),
        grid=(B,),
        in_specs=in_specs,
        out_specs=pl.BlockSpec((1, N, D), lambda b: (b, 0, 0)),
        compiler_params=pltpu.CompilerParams(
            # batch axis is independent -> shards across the 2 TCs on v7x;
            # no-op on single-TC v5e/v6e.
            dimension_semantics=("parallel",)),
    )(x, context.astype(jnp.float32), *flat_weights, params["ln_w"])


# ---------------- parameter init (deterministic, synthetic) --------------------
def init_params(key):
    n_keys = 1 + DEPTH * WEIGHTS_PER_LAYER
    keys = iter(jax.random.split(key, n_keys))

    def nrm(shape, scale=0.05):
        return (scale * jax.random.normal(next(keys), shape)).astype(jnp.float32)

    params = {"embed": nrm((NUM_TOKENS, DIM), scale=1.0)}
    layers = []
    for _ in range(DEPTH):
        layers.append({
            "sa_wq": nrm((DIM, INNER)), "sa_wk": nrm((DIM, INNER)),
            "sa_wv": nrm((DIM, INNER)), "sa_wo": nrm((INNER, DIM)),
            "ca_wq": nrm((DIM, INNER)), "ca_wk": nrm((DIM, INNER)),
            "ca_wv": nrm((DIM, INNER)), "ca_wo": nrm((INNER, DIM)),
            "ff_wi": nrm((DIM, FF_INNER)), "ff_wo": nrm((FF_INNER, DIM)),
        })
    params["layers"] = layers
    params["ln_w"] = jnp.ones((1, DIM), jnp.float32)
    return params


# ---------------- plain-JAX reference (for sanity check) ------------------------
def reference_forward(token_ids, context, params):
    x = jnp.take(params["embed"], token_ids, axis=0).astype(jnp.float32)

    def mha(xq, kv, wq, wk, wv, wo, causal):
        b, i, _ = xq.shape
        j = kv.shape[1]
        q = (xq @ wq) * SCALE
        k = kv @ wk
        v = kv @ wv
        q = q.reshape(b, i, HEADS, DIM_HEAD).transpose(0, 2, 1, 3)
        k = k.reshape(b, j, HEADS, DIM_HEAD).transpose(0, 2, 1, 3)
        v = v.reshape(b, j, HEADS, DIM_HEAD).transpose(0, 2, 1, 3)
        sim = jnp.einsum("bhid,bhjd->bhij", q, k)
        if causal:
            cmask = jnp.triu(jnp.ones((i, j), bool), k=j - i + 1)
            sim = jnp.where(cmask, MASK_VALUE, sim)
        attn = jax.nn.softmax(sim, axis=-1)
        out = jnp.einsum("bhij,bhjd->bhid", attn, v)
        out = out.transpose(0, 2, 1, 3).reshape(b, i, INNER)
        return out @ wo

    for layer in params["layers"]:
        x = mha(x, x, layer["sa_wq"], layer["sa_wk"], layer["sa_wv"],
                layer["sa_wo"], True) + x
        x = mha(x, context, layer["ca_wq"], layer["ca_wk"], layer["ca_wv"],
                layer["ca_wo"], False) + x
        h = jnp.maximum(x @ layer["ff_wi"], 0.0)
        x = h @ layer["ff_wo"] + x

    var = jnp.mean(x * x, axis=-1, keepdims=True)
    return params["ln_w"][0] * (x * lax.rsqrt(var + EPS))


# ---------------- main -----------------------------------------------------------
if __name__ == "__main__":
    key = jax.random.PRNGKey(0)
    k_tok, k_ctx, k_par = jax.random.split(key, 3)
    token_ids = jax.random.randint(k_tok, (BATCH, SEQ), 0, NUM_TOKENS,
                                   dtype=jnp.int32)
    context = jax.random.normal(k_ctx, (BATCH, CTX_SEQ, DIM), dtype=jnp.float32)
    params = init_params(k_par)

    out = jax.block_until_ready(t5_decoder_forward(token_ids, context, params))
    ref = jax.block_until_ready(reference_forward(token_ids, context, params))

    assert out.shape == (BATCH, SEQ, DIM)
    max_err = float(jnp.max(jnp.abs(out - ref)))
    assert jnp.allclose(out, ref, atol=1e-3, rtol=1e-3), (
        f"mismatch vs reference, max abs err = {max_err}")

    print("KERNEL_OK")
</pallas_src>

<mosaic_0001>
module attributes {stable_mosaic.version = 11 : i64} {
  func.func @t5_decoder_kernel(%arg0: i32, %arg1: memref<1x8x32xf32, #tpu.memory_space<vmem>>, %arg2: memref<1x16x32xf32, #tpu.memory_space<vmem>>, %arg3: memref<32x32xf32, #tpu.memory_space<vmem>>, %arg4: memref<32x32xf32, #tpu.memory_space<vmem>>, %arg5: memref<32x32xf32, #tpu.memory_space<vmem>>, %arg6: memref<32x32xf32, #tpu.memory_space<vmem>>, %arg7: memref<32x32xf32, #tpu.memory_space<vmem>>, %arg8: memref<32x32xf32, #tpu.memory_space<vmem>>, %arg9: memref<32x32xf32, #tpu.memory_space<vmem>>, %arg10: memref<32x32xf32, #tpu.memory_space<vmem>>, %arg11: memref<32x128xf32, #tpu.memory_space<vmem>>, %arg12: memref<128x32xf32, #tpu.memory_space<vmem>>, %arg13: memref<32x32xf32, #tpu.memory_space<vmem>>, %arg14: memref<32x32xf32, #tpu.memory_space<vmem>>, %arg15: memref<32x32xf32, #tpu.memory_space<vmem>>, %arg16: memref<32x32xf32, #tpu.memory_space<vmem>>, %arg17: memref<32x32xf32, #tpu.memory_space<vmem>>, %arg18: memref<32x32xf32, #tpu.memory_space<vmem>>, %arg19: memref<32x32xf32, #tpu.memory_space<vmem>>, %arg20: memref<32x32xf32, #tpu.memory_space<vmem>>, %arg21: memref<32x128xf32, #tpu.memory_space<vmem>>, %arg22: memref<128x32xf32, #tpu.memory_space<vmem>>, %arg23: memref<1x32xf32, #tpu.memory_space<vmem>>, %arg24: memref<1x8x32xf32, #tpu.memory_space<vmem>>) attributes {dimension_semantics = [#tpu.dimension_semantics<parallel>], iteration_bounds = array<i64: 2>, scalar_prefetch = 0 : i64, scratch_operands = 0 : i64, tpu.core_type = #tpu.core_type<tc>, window_params = [{transform_indices = @transform_0, window_bounds = array<i64: 1, 8, 32>}, {transform_indices = @transform_1, window_bounds = array<i64: 1, 16, 32>}, {pipeline_mode = #tpu.pipeline_mode<synchronous>, transform_indices = @transform_2, window_bounds = array<i64: 32, 32>}, {pipeline_mode = #tpu.pipeline_mode<synchronous>, transform_indices = @transform_3, window_bounds = array<i64: 32, 32>}, {pipeline_mode = #tpu.pipeline_mode<synchronous>, transform_indices = @transform_4, window_bounds = array<i64: 32, 32>}, {pipeline_mode = #tpu.pipeline_mode<synchronous>, transform_indices = @transform_5, window_bounds = array<i64: 32, 32>}, {pipeline_mode = #tpu.pipeline_mode<synchronous>, transform_indices = @transform_6, window_bounds = array<i64: 32, 32>}, {pipeline_mode = #tpu.pipeline_mode<synchronous>, transform_indices = @transform_7, window_bounds = array<i64: 32, 32>}, {pipeline_mode = #tpu.pipeline_mode<synchronous>, transform_indices = @transform_8, window_bounds = array<i64: 32, 32>}, {pipeline_mode = #tpu.pipeline_mode<synchronous>, transform_indices = @transform_9, window_bounds = array<i64: 32, 32>}, {pipeline_mode = #tpu.pipeline_mode<synchronous>, transform_indices = @transform_10, window_bounds = array<i64: 32, 128>}, {pipeline_mode = #tpu.pipeline_mode<synchronous>, transform_indices = @transform_11, window_bounds = array<i64: 128, 32>}, {pipeline_mode = #tpu.pipeline_mode<synchronous>, transform_indices = @transform_12, window_bounds = array<i64: 32, 32>}, {pipeline_mode = #tpu.pipeline_mode<synchronous>, transform_indices = @transform_13, window_bounds = array<i64: 32, 32>}, {pipeline_mode = #tpu.pipeline_mode<synchronous>, transform_indices = @transform_14, window_bounds = array<i64: 32, 32>}, {pipeline_mode = #tpu.pipeline_mode<synchronous>, transform_indices = @transform_15, window_bounds = array<i64: 32, 32>}, {pipeline_mode = #tpu.pipeline_mode<synchronous>, transform_indices = @transform_16, window_bounds = array<i64: 32, 32>}, {pipeline_mode = #tpu.pipeline_mode<synchronous>, transform_indices = @transform_17, window_bounds = array<i64: 32, 32>}, {pipeline_mode = #tpu.pipeline_mode<synchronous>, transform_indices = @transform_18, window_bounds = array<i64: 32, 32>}, {pipeline_mode = #tpu.pipeline_mode<synchronous>, transform_indices = @transform_19, window_bounds = array<i64: 32, 32>}, {pipeline_mode = #tpu.pipeline_mode<synchronous>, transform_indices = @transform_20, window_bounds = array<i64: 32, 128>}, {pipeline_mode = #tpu.pipeline_mode<synchronous>, transform_indices = @transform_21, window_bounds = array<i64: 128, 32>}, {pipeline_mode = #tpu.pipeline_mode<synchronous>, transform_indices = @transform_22, window_bounds = array<i64: 1, 32>}, {transform_indices = @transform_23, window_bounds = array<i64: 1, 8, 32>}]} {
    %c0 = arith.constant 0 : index
    %c0_0 = arith.constant 0 : index
    %c0_1 = arith.constant 0 : index
    %0 = vector.load %arg1[%c0, %c0_0, %c0_1] : memref<1x8x32xf32, #tpu.memory_space<vmem>>, vector<1x8x32xf32>
    %1 = vector.shape_cast %0 : vector<1x8x32xf32> to vector<8x32xf32>
    %c0_2 = arith.constant 0 : index
    %c0_3 = arith.constant 0 : index
    %c0_4 = arith.constant 0 : index
    %2 = vector.load %arg2[%c0_2, %c0_3, %c0_4] : memref<1x16x32xf32, #tpu.memory_space<vmem>>, vector<1x16x32xf32>
    %3 = vector.shape_cast %2 : vector<1x16x32xf32> to vector<16x32xf32>
    %4 = tpu.iota {dimensions = array<i32: 0>} : vector<8x8xi32>
    %5 = tpu.iota {dimensions = array<i32: 1>} : vector<8x8xi32>
    %6 = arith.cmpi sgt, %5, %4 : vector<8x8xi32>
    %c0_5 = arith.constant 0 : index
    %c0_6 = arith.constant 0 : index
    %7 = vector.load %arg3[%c0_5, %c0_6] : memref<32x32xf32, #tpu.memory_space<vmem>>, vector<32x32xf32>
    %cst = arith.constant dense<0.000000e+00> : vector<8x32xf32>
    %8 = tpu.matmul %1, %7, %cst {dimension_numbers = #tpu.dot_dimension_numbers<[1], [0], [0], [1], [0, 0, 1, 1], [], []>} : vector<8x32xf32>, vector<32x32xf32>, vector<8x32xf32> -> vector<8x32xf32>
    %cst_7 = arith.constant 2.500000e-01 : f32
    %9 = vector.broadcast %cst_7 : f32 to vector<8x32xf32>
    %10 = arith.mulf %8, %9 : vector<8x32xf32>
    %c0_8 = arith.constant 0 : index
    %c0_9 = arith.constant 0 : index
    %11 = vector.load %arg4[%c0_8, %c0_9] : memref<32x32xf32, #tpu.memory_space<vmem>>, vector<32x32xf32>
    %cst_10 = arith.constant dense<0.000000e+00> : vector<8x32xf32>
    %12 = tpu.matmul %1, %11, %cst_10 {dimension_numbers = #tpu.dot_dimension_numbers<[1], [0], [0], [1], [0, 0, 1, 1], [], []>} : vector<8x32xf32>, vector<32x32xf32>, vector<8x32xf32> -> vector<8x32xf32>
    %c0_11 = arith.constant 0 : index
    %c0_12 = arith.constant 0 : index
    %13 = vector.load %arg5[%c0_11, %c0_12] : memref<32x32xf32, #tpu.memory_space<vmem>>, vector<32x32xf32>
    %cst_13 = arith.constant dense<0.000000e+00> : vector<8x32xf32>
    %14 = tpu.matmul %1, %13, %cst_13 {dimension_numbers = #tpu.dot_dimension_numbers<[1], [0], [0], [1], [0, 0, 1, 1], [], []>} : vector<8x32xf32>, vector<32x32xf32>, vector<8x32xf32> -> vector<8x32xf32>
    %cst_14 = arith.constant 0.000000e+00 : f32
    %15 = vector.broadcast %cst_14 : f32 to vector<8x32xf32>
    %16 = vector.extract_strided_slice %10 {offsets = [0, 0], sizes = [8, 16], strides = [1, 1]} : vector<8x32xf32> to vector<8x16xf32>
    %17 = vector.extract_strided_slice %12 {offsets = [0, 0], sizes = [8, 16], strides = [1, 1]} : vector<8x32xf32> to vector<8x16xf32>
    %18 = vector.extract_strided_slice %14 {offsets = [0, 0], sizes = [8, 16], strides = [1, 1]} : vector<8x32xf32> to vector<8x16xf32>
    %cst_15 = arith.constant dense<0.000000e+00> : vector<8x8xf32>
    %19 = tpu.matmul %16, %17, %cst_15 {dimension_numbers = #tpu.dot_dimension_numbers<[1], [1], [0], [0], [0, 0, 1, 0], [], []>} : vector<8x16xf32>, vector<8x16xf32>, vector<8x8xf32> -> vector<8x8xf32>
    %cst_16 = arith.constant -3.40282347E+38 : f32
    %20 = vector.broadcast %cst_16 : f32 to vector<8x8xf32>
    %21 = arith.select %6, %20, %19 : vector<8x8xi1>, vector<8x8xf32>
    %cst_17 = arith.constant dense<0xFF800000> : vector<8xf32>
    %22 = vector.multi_reduction <maximumf>, %21, %cst_17 [1] : vector<8x8xf32> to vector<8xf32>
    %23 = vector.shape_cast %22 : vector<8xf32> to vector<8x1xf32>
    %24 = vector.broadcast %23 : vector<8x1xf32> to vector<8x8xf32>
    %25 = arith.subf %21, %24 : vector<8x8xf32>
    %26 = math.exp %25 : vector<8x8xf32>
    %cst_18 = arith.constant dense<0.000000e+00> : vector<8xf32>
    %27 = vector.multi_reduction <add>, %26, %cst_18 [1] : vector<8x8xf32> to vector<8xf32>
    %28 = vector.shape_cast %27 : vector<8xf32> to vector<8x1xf32>
    %29 = tpu.reciprocal %28 {approx = true} : vector<8x1xf32> -> vector<8x1xf32>
    %30 = vector.broadcast %29 : vector<8x1xf32> to vector<8x8xf32>
    %31 = arith.mulf %26, %30 : vector<8x8xf32>
    %cst_19 = arith.constant dense<0.000000e+00> : vector<8x16xf32>
    %32 = tpu.matmul %31, %18, %cst_19 {dimension_numbers = #tpu.dot_dimension_numbers<[1], [0], [0], [1], [0, 0, 1, 1], [], []>} : vector<8x8xf32>, vector<8x16xf32>, vector<8x16xf32> -> vector<8x16xf32>
    %c0_20 = arith.constant 0 : index
    %c0_21 = arith.constant 0 : index
    %33 = vector.load %arg6[%c0_20, %c0_21] : memref<32x32xf32, #tpu.memory_space<vmem>>, vector<16x32xf32>
    %cst_22 = arith.constant dense<0.000000e+00> : vector<8x32xf32>
    %34 = tpu.matmul %32, %33, %cst_22 {dimension_numbers = #tpu.dot_dimension_numbers<[1], [0], [0], [1], [0, 0, 1, 1], [], []>} : vector<8x16xf32>, vector<16x32xf32>, vector<8x32xf32> -> vector<8x32xf32>
    %35 = arith.addf %15, %34 : vector<8x32xf32>
    %36 = vector.extract_strided_slice %10 {offsets = [0, 16], sizes = [8, 16], strides = [1, 1]} : vector<8x32xf32> to vector<8x16xf32>
    %37 = vector.extract_strided_slice %12 {offsets = [0, 16], sizes = [8, 16], strides = [1, 1]} : vector<8x32xf32> to vector<8x16xf32>
    %38 = vector.extract_strided_slice %14 {offsets = [0, 16], sizes = [8, 16], strides = [1, 1]} : vector<8x32xf32> to vector<8x16xf32>
    %cst_23 = arith.constant dense<0.000000e+00> : vector<8x8xf32>
    %39 = tpu.matmul %36, %37, %cst_23 {dimension_numbers = #tpu.dot_dimension_numbers<[1], [1], [0], [0], [0, 0, 1, 0], [], []>} : vector<8x16xf32>, vector<8x16xf32>, vector<8x8xf32> -> vector<8x8xf32>
    %cst_24 = arith.constant -3.40282347E+38 : f32
    %40 = vector.broadcast %cst_24 : f32 to vector<8x8xf32>
    %41 = arith.select %6, %40, %39 : vector<8x8xi1>, vector<8x8xf32>
    %cst_25 = arith.constant dense<0xFF800000> : vector<8xf32>
    %42 = vector.multi_reduction <maximumf>, %41, %cst_25 [1] : vector<8x8xf32> to vector<8xf32>
    %43 = vector.shape_cast %42 : vector<8xf32> to vector<8x1xf32>
    %44 = vector.broadcast %43 : vector<8x1xf32> to vector<8x8xf32>
    %45 = arith.subf %41, %44 : vector<8x8xf32>
    %46 = math.exp %45 : vector<8x8xf32>
    %cst_26 = arith.constant dense<0.000000e+00> : vector<8xf32>
    %47 = vector.multi_reduction <add>, %46, %cst_26 [1] : vector<8x8xf32> to vector<8xf32>
    %48 = vector.shape_cast %47 : vector<8xf32> to vector<8x1xf32>
    %49 = tpu.reciprocal %48 {approx = true} : vector<8x1xf32> -> vector<8x1xf32>
    %50 = vector.broadcast %49 : vector<8x1xf32> to vector<8x8xf32>
    %51 = arith.mulf %46, %50 : vector<8x8xf32>
    %cst_27 = arith.constant dense<0.000000e+00> : vector<8x16xf32>
    %52 = tpu.matmul %51, %38, %cst_27 {dimension_numbers = #tpu.dot_dimension_numbers<[1], [0], [0], [1], [0, 0, 1, 1], [], []>} : vector<8x8xf32>, vector<8x16xf32>, vector<8x16xf32> -> vector<8x16xf32>
    %c16 = arith.constant 16 : index
    %c0_28 = arith.constant 0 : index
    %53 = vector.load %arg6[%c16, %c0_28] : memref<32x32xf32, #tpu.memory_space<vmem>>, vector<16x32xf32>
    %cst_29 = arith.constant dense<0.000000e+00> : vector<8x32xf32>
    %54 = tpu.matmul %52, %53, %cst_29 {dimension_numbers = #tpu.dot_dimension_numbers<[1], [0], [0], [1], [0, 0, 1, 1], [], []>} : vector<8x16xf32>, vector<16x32xf32>, vector<8x32xf32> -> vector<8x32xf32>
    %55 = arith.addf %35, %54 : vector<8x32xf32>
    %56 = arith.addf %55, %1 : vector<8x32xf32>
    %c0_30 = arith.constant 0 : index
    %c0_31 = arith.constant 0 : index
    %57 = vector.load %arg7[%c0_30, %c0_31] : memref<32x32xf32, #tpu.memory_space<vmem>>, vector<32x32xf32>
    %cst_32 = arith.constant dense<0.000000e+00> : vector<8x32xf32>
    %58 = tpu.matmul %56, %57, %cst_32 {dimension_numbers = #tpu.dot_dimension_numbers<[1], [0], [0], [1], [0, 0, 1, 1], [], []>} : vector<8x32xf32>, vector<32x32xf32>, vector<8x32xf32> -> vector<8x32xf32>
    %cst_33 = arith.constant 2.500000e-01 : f32
    %59 = vector.broadcast %cst_33 : f32 to vector<8x32xf32>
    %60 = arith.mulf %58, %59 : vector<8x32xf32>
    %c0_34 = arith.constant 0 : index
    %c0_35 = arith.constant 0 : index
    %61 = vector.load %arg8[%c0_34, %c0_35] : memref<32x32xf32, #tpu.memory_space<vmem>>, vector<32x32xf32>
    %cst_36 = arith.constant dense<0.000000e+00> : vector<16x32xf32>
    %62 = tpu.matmul %3, %61, %cst_36 {dimension_numbers = #tpu.dot_dimension_numbers<[1], [0], [0], [1], [0, 0, 1, 1], [], []>} : vector<16x32xf32>, vector<32x32xf32>, vector<16x32xf32> -> vector<16x32xf32>
    %c0_37 = arith.constant 0 : index
    %c0_38 = arith.constant 0 : index
    %63 = vector.load %arg9[%c0_37, %c0_38] : memref<32x32xf32, #tpu.memory_space<vmem>>, vector<32x32xf32>
    %cst_39 = arith.constant dense<0.000000e+00> : vector<16x32xf32>
    %64 = tpu.matmul %3, %63, %cst_39 {dimension_numbers = #tpu.dot_dimension_numbers<[1], [0], [0], [1], [0, 0, 1, 1], [], []>} : vector<16x32xf32>, vector<32x32xf32>, vector<16x32xf32> -> vector<16x32xf32>
    %cst_40 = arith.constant 0.000000e+00 : f32
    %65 = vector.broadcast %cst_40 : f32 to vector<8x32xf32>
    %66 = vector.extract_strided_slice %60 {offsets = [0, 0], sizes = [8, 16], strides = [1, 1]} : vector<8x32xf32> to vector<8x16xf32>
    %67 = vector.extract_strided_slice %62 {offsets = [0, 0], sizes = [16, 16], strides = [1, 1]} : vector<16x32xf32> to vector<16x16xf32>
    %68 = vector.extract_strided_slice %64 {offsets = [0, 0], sizes = [16, 16], strides = [1, 1]} : vector<16x32xf32> to vector<16x16xf32>
    %cst_41 = arith.constant dense<0.000000e+00> : vector<8x16xf32>
    %69 = tpu.matmul %66, %67, %cst_41 {dimension_numbers = #tpu.dot_dimension_numbers<[1], [1], [0], [0], [0, 0, 1, 0], [], []>} : vector<8x16xf32>, vector<16x16xf32>, vector<8x16xf32> -> vector<8x16xf32>
    %cst_42 = arith.constant dense<0xFF800000> : vector<8xf32>
    %70 = vector.multi_reduction <maximumf>, %69, %cst_42 [1] : vector<8x16xf32> to vector<8xf32>
    %71 = vector.shape_cast %70 : vector<8xf32> to vector<8x1xf32>
    %72 = vector.broadcast %71 : vector<8x1xf32> to vector<8x16xf32>
    %73 = arith.subf %69, %72 : vector<8x16xf32>
    %74 = math.exp %73 : vector<8x16xf32>
    %cst_43 = arith.constant dense<0.000000e+00> : vector<8xf32>
    %75 = vector.multi_reduction <add>, %74, %cst_43 [1] : vector<8x16xf32> to vector<8xf32>
    %76 = vector.shape_cast %75 : vector<8xf32> to vector<8x1xf32>
    %77 = tpu.reciprocal %76 {approx = true} : vector<8x1xf32> -> vector<8x1xf32>
    %78 = vector.broadcast %77 : vector<8x1xf32> to vector<8x16xf32>
    %79 = arith.mulf %74, %78 : vector<8x16xf32>
    %cst_44 = arith.constant dense<0.000000e+00> : vector<8x16xf32>
    %80 = tpu.matmul %79, %68, %cst_44 {dimension_numbers = #tpu.dot_dimension_numbers<[1], [0], [0], [1], [0, 0, 1, 1], [], []>} : vector<8x16xf32>, vector<16x16xf32>, vector<8x16xf32> -> vector<8x16xf32>
    %c0_45 = arith.constant 0 : index
    %c0_46 = arith.constant 0 : index
    %81 = vector.load %arg10[%c0_45, %c0_46] : memref<32x32xf32, #tpu.memory_space<vmem>>, vector<16x32xf32>
    %cst_47 = arith.constant dense<0.000000e+00> : vector<8x32xf32>
    %82 = tpu.matmul %80, %81, %cst_47 {dimension_numbers = #tpu.dot_dimension_numbers<[1], [0], [0], [1], [0, 0, 1, 1], [], []>} : vector<8x16xf32>, vector<16x32xf32>, vector<8x32xf32> -> vector<8x32xf32>
    %83 = arith.addf %65, %82 : vector<8x32xf32>
    %84 = vector.extract_strided_slice %60 {offsets = [0, 16], sizes = [8, 16], strides = [1, 1]} : vector<8x32xf32> to vector<8x16xf32>
    %85 = vector.extract_strided_slice %62 {offsets = [0, 16], sizes = [16, 16], strides = [1, 1]} : vector<16x32xf32> to vector<16x16xf32>
    %86 = vector.extract_strided_slice %64 {offsets = [0, 16], sizes = [16, 16], strides = [1, 1]} : vector<16x32xf32> to vector<16x16xf32>
    %cst_48 = arith.constant dense<0.000000e+00> : vector<8x16xf32>
    %87 = tpu.matmul %84, %85, %cst_48 {dimension_numbers = #tpu.dot_dimension_numbers<[1], [1], [0], [0], [0, 0, 1, 0], [], []>} : vector<8x16xf32>, vector<16x16xf32>, vector<8x16xf32> -> vector<8x16xf32>
    %cst_49 = arith.constant dense<0xFF800000> : vector<8xf32>
    %88 = vector.multi_reduction <maximumf>, %87, %cst_49 [1] : vector<8x16xf32> to vector<8xf32>
    %89 = vector.shape_cast %88 : vector<8xf32> to vector<8x1xf32>
    %90 = vector.broadcast %89 : vector<8x1xf32> to vector<8x16xf32>
    %91 = arith.subf %87, %90 : vector<8x16xf32>
    %92 = math.exp %91 : vector<8x16xf32>
    %cst_50 = arith.constant dense<0.000000e+00> : vector<8xf32>
    %93 = vector.multi_reduction <add>, %92, %cst_50 [1] : vector<8x16xf32> to vector<8xf32>
    %94 = vector.shape_cast %93 : vector<8xf32> to vector<8x1xf32>
    %95 = tpu.reciprocal %94 {approx = true} : vector<8x1xf32> -> vector<8x1xf32>
    %96 = vector.broadcast %95 : vector<8x1xf32> to vector<8x16xf32>
    %97 = arith.mulf %92, %96 : vector<8x16xf32>
    %cst_51 = arith.constant dense<0.000000e+00> : vector<8x16xf32>
    %98 = tpu.matmul %97, %86, %cst_51 {dimension_numbers = #tpu.dot_dimension_numbers<[1], [0], [0], [1], [0, 0, 1, 1], [], []>} : vector<8x16xf32>, vector<16x16xf32>, vector<8x16xf32> -> vector<8x16xf32>
    %c16_52 = arith.constant 16 : index
    %c0_53 = arith.constant 0 : index
    %99 = vector.load %arg10[%c16_52, %c0_53] : memref<32x32xf32, #tpu.memory_space<vmem>>, vector<16x32xf32>
    %cst_54 = arith.constant dense<0.000000e+00> : vector<8x32xf32>
    %100 = tpu.matmul %98, %99, %cst_54 {dimension_numbers = #tpu.dot_dimension_numbers<[1], [0], [0], [1], [0, 0, 1, 1], [], []>} : vector<8x16xf32>, vector<16x32xf32>, vector<8x32xf32> -> vector<8x32xf32>
    %101 = arith.addf %83, %100 : vector<8x32xf32>
    %102 = arith.addf %101, %56 : vector<8x32xf32>
    %c0_55 = arith.constant 0 : index
    %c0_56 = arith.constant 0 : index
    %103 = vector.load %arg11[%c0_55, %c0_56] : memref<32x128xf32, #tpu.memory_space<vmem>>, vector<32x128xf32>
    %cst_57 = arith.constant dense<0.000000e+00> : vector<8x128xf32>
    %104 = tpu.matmul %102, %103, %cst_57 {dimension_numbers = #tpu.dot_dimension_numbers<[1], [0], [0], [1], [0, 0, 1, 1], [], []>} : vector<8x32xf32>, vector<32x128xf32>, vector<8x128xf32> -> vector<8x128xf32>
    %cst_58 = arith.constant 0.000000e+00 : f32
    %105 = vector.broadcast %cst_58 : f32 to vector<8x128xf32>
    %106 = arith.maximumf %104, %105 : vector<8x128xf32>
    %c0_59 = arith.constant 0 : index
    %c0_60 = arith.constant 0 : index
    %107 = vector.load %arg12[%c0_59, %c0_60] : memref<128x32xf32, #tpu.memory_space<vmem>>, vector<128x32xf32>
    %cst_61 = arith.constant dense<0.000000e+00> : vector<8x32xf32>
    %108 = tpu.matmul %106, %107, %cst_61 {dimension_numbers = #tpu.dot_dimension_numbers<[1], [0], [0], [1], [0, 0, 1, 1], [], []>} : vector<8x128xf32>, vector<128x32xf32>, vector<8x32xf32> -> vector<8x32xf32>
    %109 = arith.addf %108, %102 : vector<8x32xf32>
    %c0_62 = arith.constant 0 : index
    %c0_63 = arith.constant 0 : index
    %110 = vector.load %arg13[%c0_62, %c0_63] : memref<32x32xf32, #tpu.memory_space<vmem>>, vector<32x32xf32>
    %cst_64 = arith.constant dense<0.000000e+00> : vector<8x32xf32>
    %111 = tpu.matmul %109, %110, %cst_64 {dimension_numbers = #tpu.dot_dimension_numbers<[1], [0], [0], [1], [0, 0, 1, 1], [], []>} : vector<8x32xf32>, vector<32x32xf32>, vector<8x32xf32> -> vector<8x32xf32>
    %cst_65 = arith.constant 2.500000e-01 : f32
    %112 = vector.broadcast %cst_65 : f32 to vector<8x32xf32>
    %113 = arith.mulf %111, %112 : vector<8x32xf32>
    %c0_66 = arith.constant 0 : index
    %c0_67 = arith.constant 0 : index
    %114 = vector.load %arg14[%c0_66, %c0_67] : memref<32x32xf32, #tpu.memory_space<vmem>>, vector<32x32xf32>
    %cst_68 = arith.constant dense<0.000000e+00> : vector<8x32xf32>
    %115 = tpu.matmul %109, %114, %cst_68 {dimension_numbers = #tpu.dot_dimension_numbers<[1], [0], [0], [1], [0, 0, 1, 1], [], []>} : vector<8x32xf32>, vector<32x32xf32>, vector<8x32xf32> -> vector<8x32xf32>
    %c0_69 = arith.constant 0 : index
    %c0_70 = arith.constant 0 : index
    %116 = vector.load %arg15[%c0_69, %c0_70] : memref<32x32xf32, #tpu.memory_space<vmem>>, vector<32x32xf32>
    %cst_71 = arith.constant dense<0.000000e+00> : vector<8x32xf32>
    %117 = tpu.matmul %109, %116, %cst_71 {dimension_numbers = #tpu.dot_dimension_numbers<[1], [0], [0], [1], [0, 0, 1, 1], [], []>} : vector<8x32xf32>, vector<32x32xf32>, vector<8x32xf32> -> vector<8x32xf32>
    %cst_72 = arith.constant 0.000000e+00 : f32
    %118 = vector.broadcast %cst_72 : f32 to vector<8x32xf32>
    %119 = vector.extract_strided_slice %113 {offsets = [0, 0], sizes = [8, 16], strides = [1, 1]} : vector<8x32xf32> to vector<8x16xf32>
    %120 = vector.extract_strided_slice %115 {offsets = [0, 0], sizes = [8, 16], strides = [1, 1]} : vector<8x32xf32> to vector<8x16xf32>
    %121 = vector.extract_strided_slice %117 {offsets = [0, 0], sizes = [8, 16], strides = [1, 1]} : vector<8x32xf32> to vector<8x16xf32>
    %cst_73 = arith.constant dense<0.000000e+00> : vector<8x8xf32>
    %122 = tpu.matmul %119, %120, %cst_73 {dimension_numbers = #tpu.dot_dimension_numbers<[1], [1], [0], [0], [0, 0, 1, 0], [], []>} : vector<8x16xf32>, vector<8x16xf32>, vector<8x8xf32> -> vector<8x8xf32>
    %cst_74 = arith.constant -3.40282347E+38 : f32
    %123 = vector.broadcast %cst_74 : f32 to vector<8x8xf32>
    %124 = arith.select %6, %123, %122 : vector<8x8xi1>, vector<8x8xf32>
    %cst_75 = arith.constant dense<0xFF800000> : vector<8xf32>
    %125 = vector.multi_reduction <maximumf>, %124, %cst_75 [1] : vector<8x8xf32> to vector<8xf32>
    %126 = vector.shape_cast %125 : vector<8xf32> to vector<8x1xf32>
    %127 = vector.broadcast %126 : vector<8x1xf32> to vector<8x8xf32>
    %128 = arith.subf %124, %127 : vector<8x8xf32>
    %129 = math.exp %128 : vector<8x8xf32>
    %cst_76 = arith.constant dense<0.000000e+00> : vector<8xf32>
    %130 = vector.multi_reduction <add>, %129, %cst_76 [1] : vector<8x8xf32> to vector<8xf32>
    %131 = vector.shape_cast %130 : vector<8xf32> to vector<8x1xf32>
    %132 = tpu.reciprocal %131 {approx = true} : vector<8x1xf32> -> vector<8x1xf32>
    %133 = vector.broadcast %132 : vector<8x1xf32> to vector<8x8xf32>
    %134 = arith.mulf %129, %133 : vector<8x8xf32>
    %cst_77 = arith.constant dense<0.000000e+00> : vector<8x16xf32>
    %135 = tpu.matmul %134, %121, %cst_77 {dimension_numbers = #tpu.dot_dimension_numbers<[1], [0], [0], [1], [0, 0, 1, 1], [], []>} : vector<8x8xf32>, vector<8x16xf32>, vector<8x16xf32> -> vector<8x16xf32>
    %c0_78 = arith.constant 0 : index
    %c0_79 = arith.constant 0 : index
    %136 = vector.load %arg16[%c0_78, %c0_79] : memref<32x32xf32, #tpu.memory_space<vmem>>, vector<16x32xf32>
    %cst_80 = arith.constant dense<0.000000e+00> : vector<8x32xf32>
    %137 = tpu.matmul %135, %136, %cst_80 {dimension_numbers = #tpu.dot_dimension_numbers<[1], [0], [0], [1], [0, 0, 1, 1], [], []>} : vector<8x16xf32>, vector<16x32xf32>, vector<8x32xf32> -> vector<8x32xf32>
    %138 = arith.addf %118, %137 : vector<8x32xf32>
    %139 = vector.extract_strided_slice %113 {offsets = [0, 16], sizes = [8, 16], strides = [1, 1]} : vector<8x32xf32> to vector<8x16xf32>
    %140 = vector.extract_strided_slice %115 {offsets = [0, 16], sizes = [8, 16], strides = [1, 1]} : vector<8x32xf32> to vector<8x16xf32>
    %141 = vector.extract_strided_slice %117 {offsets = [0, 16], sizes = [8, 16], strides = [1, 1]} : vector<8x32xf32> to vector<8x16xf32>
    %cst_81 = arith.constant dense<0.000000e+00> : vector<8x8xf32>
    %142 = tpu.matmul %139, %140, %cst_81 {dimension_numbers = #tpu.dot_dimension_numbers<[1], [1], [0], [0], [0, 0, 1, 0], [], []>} : vector<8x16xf32>, vector<8x16xf32>, vector<8x8xf32> -> vector<8x8xf32>
    %cst_82 = arith.constant -3.40282347E+38 : f32
    %143 = vector.broadcast %cst_82 : f32 to vector<8x8xf32>
    %144 = arith.select %6, %143, %142 : vector<8x8xi1>, vector<8x8xf32>
    %cst_83 = arith.constant dense<0xFF800000> : vector<8xf32>
    %145 = vector.multi_reduction <maximumf>, %144, %cst_83 [1] : vector<8x8xf32> to vector<8xf32>
    %146 = vector.shape_cast %145 : vector<8xf32> to vector<8x1xf32>
    %147 = vector.broadcast %146 : vector<8x1xf32> to vector<8x8xf32>
    %148 = arith.subf %144, %147 : vector<8x8xf32>
    %149 = math.exp %148 : vector<8x8xf32>
    %cst_84 = arith.constant dense<0.000000e+00> : vector<8xf32>
    %150 = vector.multi_reduction <add>, %149, %cst_84 [1] : vector<8x8xf32> to vector<8xf32>
    %151 = vector.shape_cast %150 : vector<8xf32> to vector<8x1xf32>
    %152 = tpu.reciprocal %151 {approx = true} : vector<8x1xf32> -> vector<8x1xf32>
    %153 = vector.broadcast %152 : vector<8x1xf32> to vector<8x8xf32>
    %154 = arith.mulf %149, %153 : vector<8x8xf32>
    %cst_85 = arith.constant dense<0.000000e+00> : vector<8x16xf32>
    %155 = tpu.matmul %154, %141, %cst_85 {dimension_numbers = #tpu.dot_dimension_numbers<[1], [0], [0], [1], [0, 0, 1, 1], [], []>} : vector<8x8xf32>, vector<8x16xf32>, vector<8x16xf32> -> vector<8x16xf32>
    %c16_86 = arith.constant 16 : index
    %c0_87 = arith.constant 0 : index
    %156 = vector.load %arg16[%c16_86, %c0_87] : memref<32x32xf32, #tpu.memory_space<vmem>>, vector<16x32xf32>
    %cst_88 = arith.constant dense<0.000000e+00> : vector<8x32xf32>
    %157 = tpu.matmul %155, %156, %cst_88 {dimension_numbers = #tpu.dot_dimension_numbers<[1], [0], [0], [1], [0, 0, 1, 1], [], []>} : vector<8x16xf32>, vector<16x32xf32>, vector<8x32xf32> -> vector<8x32xf32>
    %158 = arith.addf %138, %157 : vector<8x32xf32>
    %159 = arith.addf %158, %109 : vector<8x32xf32>
    %c0_89 = arith.constant 0 : index
    %c0_90 = arith.constant 0 : index
    %160 = vector.load %arg17[%c0_89, %c0_90] : memref<32x32xf32, #tpu.memory_space<vmem>>, vector<32x32xf32>
    %cst_91 = arith.constant dense<0.000000e+00> : vector<8x32xf32>
    %161 = tpu.matmul %159, %160, %cst_91 {dimension_numbers = #tpu.dot_dimension_numbers<[1], [0], [0], [1], [0, 0, 1, 1], [], []>} : vector<8x32xf32>, vector<32x32xf32>, vector<8x32xf32> -> vector<8x32xf32>
    %cst_92 = arith.constant 2.500000e-01 : f32
    %162 = vector.broadcast %cst_92 : f32 to vector<8x32xf32>
    %163 = arith.mulf %161, %162 : vector<8x32xf32>
    %c0_93 = arith.constant 0 : index
    %c0_94 = arith.constant 0 : index
    %164 = vector.load %arg18[%c0_93, %c0_94] : memref<32x32xf32, #tpu.memory_space<vmem>>, vector<32x32xf32>
    %cst_95 = arith.constant dense<0.000000e+00> : vector<16x32xf32>
    %165 = tpu.matmul %3, %164, %cst_95 {dimension_numbers = #tpu.dot_dimension_numbers<[1], [0], [0], [1], [0, 0, 1, 1], [], []>} : vector<16x32xf32>, vector<32x32xf32>, vector<16x32xf32> -> vector<16x32xf32>
    %c0_96 = arith.constant 0 : index
    %c0_97 = arith.constant 0 : index
    %166 = vector.load %arg19[%c0_96, %c0_97] : memref<32x32xf32, #tpu.memory_space<vmem>>, vector<32x32xf32>
    %cst_98 = arith.constant dense<0.000000e+00> : vector<16x32xf32>
    %167 = tpu.matmul %3, %166, %cst_98 {dimension_numbers = #tpu.dot_dimension_numbers<[1], [0], [0], [1], [0, 0, 1, 1], [], []>} : vector<16x32xf32>, vector<32x32xf32>, vector<16x32xf32> -> vector<16x32xf32>
    %cst_99 = arith.constant 0.000000e+00 : f32
    %168 = vector.broadcast %cst_99 : f32 to vector<8x32xf32>
    %169 = vector.extract_strided_slice %163 {offsets = [0, 0], sizes = [8, 16], strides = [1, 1]} : vector<8x32xf32> to vector<8x16xf32>
    %170 = vector.extract_strided_slice %165 {offsets = [0, 0], sizes = [16, 16], strides = [1, 1]} : vector<16x32xf32> to vector<16x16xf32>
    %171 = vector.extract_strided_slice %167 {offsets = [0, 0], sizes = [16, 16], strides = [1, 1]} : vector<16x32xf32> to vector<16x16xf32>
    %cst_100 = arith.constant dense<0.000000e+00> : vector<8x16xf32>
    %172 = tpu.matmul %169, %170, %cst_100 {dimension_numbers = #tpu.dot_dimension_numbers<[1], [1], [0], [0], [0, 0, 1, 0], [], []>} : vector<8x16xf32>, vector<16x16xf32>, vector<8x16xf32> -> vector<8x16xf32>
    %cst_101 = arith.constant dense<0xFF800000> : vector<8xf32>
    %173 = vector.multi_reduction <maximumf>, %172, %cst_101 [1] : vector<8x16xf32> to vector<8xf32>
    %174 = vector.shape_cast %173 : vector<8xf32> to vector<8x1xf32>
    %175 = vector.broadcast %174 : vector<8x1xf32> to vector<8x16xf32>
    %176 = arith.subf %172, %175 : vector<8x16xf32>
    %177 = math.exp %176 : vector<8x16xf32>
    %cst_102 = arith.constant dense<0.000000e+00> : vector<8xf32>
    %178 = vector.multi_reduction <add>, %177, %cst_102 [1] : vector<8x16xf32> to vector<8xf32>
    %179 = vector.shape_cast %178 : vector<8xf32> to vector<8x1xf32>
    %180 = tpu.reciprocal %179 {approx = true} : vector<8x1xf32> -> vector<8x1xf32>
    %181 = vector.broadcast %180 : vector<8x1xf32> to vector<8x16xf32>
    %182 = arith.mulf %177, %181 : vector<8x16xf32>
    %cst_103 = arith.constant dense<0.000000e+00> : vector<8x16xf32>
    %183 = tpu.matmul %182, %171, %cst_103 {dimension_numbers = #tpu.dot_dimension_numbers<[1], [0], [0], [1], [0, 0, 1, 1], [], []>} : vector<8x16xf32>, vector<16x16xf32>, vector<8x16xf32> -> vector<8x16xf32>
    %c0_104 = arith.constant 0 : index
    %c0_105 = arith.constant 0 : index
    %184 = vector.load %arg20[%c0_104, %c0_105] : memref<32x32xf32, #tpu.memory_space<vmem>>, vector<16x32xf32>
    %cst_106 = arith.constant dense<0.000000e+00> : vector<8x32xf32>
    %185 = tpu.matmul %183, %184, %cst_106 {dimension_numbers = #tpu.dot_dimension_numbers<[1], [0], [0], [1], [0, 0, 1, 1], [], []>} : vector<8x16xf32>, vector<16x32xf32>, vector<8x32xf32> -> vector<8x32xf32>
    %186 = arith.addf %168, %185 : vector<8x32xf32>
    %187 = vector.extract_strided_slice %163 {offsets = [0, 16], sizes = [8, 16], strides = [1, 1]} : vector<8x32xf32> to vector<8x16xf32>
    %188 = vector.extract_strided_slice %165 {offsets = [0, 16], sizes = [16, 16], strides = [1, 1]} : vector<16x32xf32> to vector<16x16xf32>
    %189 = vector.extract_strided_slice %167 {offsets = [0, 16], sizes = [16, 16], strides = [1, 1]} : vector<16x32xf32> to vector<16x16xf32>
    %cst_107 = arith.constant dense<0.000000e+00> : vector<8x16xf32>
    %190 = tpu.matmul %187, %188, %cst_107 {dimension_numbers = #tpu.dot_dimension_numbers<[1], [1], [0], [0], [0, 0, 1, 0], [], []>} : vector<8x16xf32>, vector<16x16xf32>, vector<8x16xf32> -> vector<8x16xf32>
    %cst_108 = arith.constant dense<0xFF800000> : vector<8xf32>
    %191 = vector.multi_reduction <maximumf>, %190, %cst_108 [1] : vector<8x16xf32> to vector<8xf32>
    %192 = vector.shape_cast %191 : vector<8xf32> to vector<8x1xf32>
    %193 = vector.broadcast %192 : vector<8x1xf32> to vector<8x16xf32>
    %194 = arith.subf %190, %193 : vector<8x16xf32>
    %195 = math.exp %194 : vector<8x16xf32>
    %cst_109 = arith.constant dense<0.000000e+00> : vector<8xf32>
    %196 = vector.multi_reduction <add>, %195, %cst_109 [1] : vector<8x16xf32> to vector<8xf32>
    %197 = vector.shape_cast %196 : vector<8xf32> to vector<8x1xf32>
    %198 = tpu.reciprocal %197 {approx = true} : vector<8x1xf32> -> vector<8x1xf32>
    %199 = vector.broadcast %198 : vector<8x1xf32> to vector<8x16xf32>
    %200 = arith.mulf %195, %199 : vector<8x16xf32>
    %cst_110 = arith.constant dense<0.000000e+00> : vector<8x16xf32>
    %201 = tpu.matmul %200, %189, %cst_110 {dimension_numbers = #tpu.dot_dimension_numbers<[1], [0], [0], [1], [0, 0, 1, 1], [], []>} : vector<8x16xf32>, vector<16x16xf32>, vector<8x16xf32> -> vector<8x16xf32>
    %c16_111 = arith.constant 16 : index
    %c0_112 = arith.constant 0 : index
    %202 = vector.load %arg20[%c16_111, %c0_112] : memref<32x32xf32, #tpu.memory_space<vmem>>, vector<16x32xf32>
    %cst_113 = arith.constant dense<0.000000e+00> : vector<8x32xf32>
    %203 = tpu.matmul %201, %202, %cst_113 {dimension_numbers = #tpu.dot_dimension_numbers<[1], [0], [0], [1], [0, 0, 1, 1], [], []>} : vector<8x16xf32>, vector<16x32xf32>, vector<8x32xf32> -> vector<8x32xf32>
    %204 = arith.addf %186, %203 : vector<8x32xf32>
    %205 = arith.addf %204, %159 : vector<8x32xf32>
    %c0_114 = arith.constant 0 : index
    %c0_115 = arith.constant 0 : index
    %206 = vector.load %arg21[%c0_114, %c0_115] : memref<32x128xf32, #tpu.memory_space<vmem>>, vector<32x128xf32>
    %cst_116 = arith.constant dense<0.000000e+00> : vector<8x128xf32>
    %207 = tpu.matmul %205, %206, %cst_116 {dimension_numbers = #tpu.dot_dimension_numbers<[1], [0], [0], [1], [0, 0, 1, 1], [], []>} : vector<8x32xf32>, vector<32x128xf32>, vector<8x128xf32> -> vector<8x128xf32>
    %cst_117 = arith.constant 0.000000e+00 : f32
    %208 = vector.broadcast %cst_117 : f32 to vector<8x128xf32>
    %209 = arith.maximumf %207, %208 : vector<8x128xf32>
    %c0_118 = arith.constant 0 : index
    %c0_119 = arith.constant 0 : index
    %210 = vector.load %arg22[%c0_118, %c0_119] : memref<128x32xf32, #tpu.memory_space<vmem>>, vector<128x32xf32>
    %cst_120 = arith.constant dense<0.000000e+00> : vector<8x32xf32>
    %211 = tpu.matmul %209, %210, %cst_120 {dimension_numbers = #tpu.dot_dimension_numbers<[1], [0], [0], [1], [0, 0, 1, 1], [], []>} : vector<8x128xf32>, vector<128x32xf32>, vector<8x32xf32> -> vector<8x32xf32>
    %212 = arith.addf %211, %205 : vector<8x32xf32>
    %213 = arith.mulf %212, %212 : vector<8x32xf32>
    %cst_121 = arith.constant dense<0.000000e+00> : vector<8xf32>
    %214 = vector.multi_reduction <add>, %213, %cst_121 [1] : vector<8x32xf32> to vector<8xf32>
    %215 = vector.shape_cast %214 : vector<8xf32> to vector<8x1xf32>
    %cst_122 = arith.constant 3.200000e+01 : f32
    %216 = vector.broadcast %cst_122 : f32 to vector<8x1xf32>
    %217 = arith.divf %215, %216 : vector<8x1xf32>
    %c0_123 = arith.constant 0 : index
    %c0_124 = arith.constant 0 : index
    %218 = vector.load %arg23[%c0_123, %c0_124] : memref<1x32xf32, #tpu.memory_space<vmem>>, vector<1x32xf32>
    %cst_125 = arith.constant 9.99999997E-7 : f32
    %219 = vector.broadcast %cst_125 : f32 to vector<8x1xf32>
    %220 = arith.addf %217, %219 : vector<8x1xf32>
    %221 = math.rsqrt %220 : vector<8x1xf32>
    %222 = vector.broadcast %221 : vector<8x1xf32> to vector<8x32xf32>
    %223 = arith.mulf %212, %222 : vector<8x32xf32>
    %224 = vector.broadcast %218 : vector<1x32xf32> to vector<8x32xf32>
    %225 = arith.mulf %224, %223 : vector<8x32xf32>
    %c0_126 = arith.constant 0 : index
    %c0_127 = arith.constant 0 : index
    %c0_128 = arith.constant 0 : index
    %226 = vector.load %arg24[%c0_126, %c0_127, %c0_128] : memref<1x8x32xf32, #tpu.memory_space<vmem>>, vector<1x8x32xf32>
    %227 = vector.shape_cast %226 : vector<1x8x32xf32> to vector<8x32xf32>
    %228 = vector.shape_cast %225 : vector<8x32xf32> to vector<1x8x32xf32>
    tpu.vector_store %arg24[%c0_126, %c0_127, %c0_128], %228 {strides = array<i32>} : memref<1x8x32xf32, #tpu.memory_space<vmem>>, vector<1x8x32xf32>,
    return
  }
  func.func @transform_0(%arg0: i32) -> (i32, i32, i32) {
    %c0_i32 = arith.constant 0 : i32
    %c0_i32_0 = arith.constant 0 : i32
    %c0_i32_1 = arith.constant 0 : i32
    return %arg0, %c0_i32, %c0_i32_0 : i32, i32, i32
  }
  func.func @transform_1(%arg0: i32) -> (i32, i32, i32) {
    %c0_i32 = arith.constant 0 : i32
    %c0_i32_0 = arith.constant 0 : i32
    %c0_i32_1 = arith.constant 0 : i32
    return %arg0, %c0_i32, %c0_i32_0 : i32, i32, i32
  }
  func.func @transform_2(%arg0: i32) -> (i32, i32) {
    %c0_i32 = arith.constant 0 : i32
    %c0_i32_0 = arith.constant 0 : i32
    %c0_i32_1 = arith.constant 0 : i32
    return %c0_i32, %c0_i32_0 : i32, i32
  }
  func.func @transform_3(%arg0: i32) -> (i32, i32) {
    %c0_i32 = arith.constant 0 : i32
    %c0_i32_0 = arith.constant 0 : i32
    %c0_i32_1 = arith.constant 0 : i32
    return %c0_i32, %c0_i32_0 : i32, i32
  }
  func.func @transform_4(%arg0: i32) -> (i32, i32) {
    %c0_i32 = arith.constant 0 : i32
    %c0_i32_0 = arith.constant 0 : i32
    %c0_i32_1 = arith.constant 0 : i32
    return %c0_i32, %c0_i32_0 : i32, i32
  }
  func.func @transform_5(%arg0: i32) -> (i32, i32) {
    %c0_i32 = arith.constant 0 : i32
    %c0_i32_0 = arith.constant 0 : i32
    %c0_i32_1 = arith.constant 0 : i32
    return %c0_i32, %c0_i32_0 : i32, i32
  }
  func.func @transform_6(%arg0: i32) -> (i32, i32) {
    %c0_i32 = arith.constant 0 : i32
    %c0_i32_0 = arith.constant 0 : i32
    %c0_i32_1 = arith.constant 0 : i32
    return %c0_i32, %c0_i32_0 : i32, i32
  }
  func.func @transform_7(%arg0: i32) -> (i32, i32) {
    %c0_i32 = arith.constant 0 : i32
    %c0_i32_0 = arith.constant 0 : i32
    %c0_i32_1 = arith.constant 0 : i32
    return %c0_i32, %c0_i32_0 : i32, i32
  }
  func.func @transform_8(%arg0: i32) -> (i32, i32) {
    %c0_i32 = arith.constant 0 : i32
    %c0_i32_0 = arith.constant 0 : i32
    %c0_i32_1 = arith.constant 0 : i32
    return %c0_i32, %c0_i32_0 : i32, i32
  }
  func.func @transform_9(%arg0: i32) -> (i32, i32) {
    %c0_i32 = arith.constant 0 : i32
    %c0_i32_0 = arith.constant 0 : i32
    %c0_i32_1 = arith.constant 0 : i32
    return %c0_i32, %c0_i32_0 : i32, i32
  }
  func.func @transform_10(%arg0: i32) -> (i32, i32) {
    %c0_i32 = arith.constant 0 : i32
    %c0_i32_0 = arith.constant 0 : i32
    %c0_i32_1 = arith.constant 0 : i32
    return %c0_i32, %c0_i32_0 : i32, i32
  }
  func.func @transform_11(%arg0: i32) -> (i32, i32) {
    %c0_i32 = arith.constant 0 : i32
    %c0_i32_0 = arith.constant 0 : i32
    %c0_i32_1 = arith.constant 0 : i32
    return %c0_i32, %c0_i32_0 : i32, i32
  }
  func.func @transform_12(%arg0: i32) -> (i32, i32) {
    %c0_i32 = arith.constant 0 : i32
    %c0_i32_0 = arith.constant 0 : i32
    %c0_i32_1 = arith.constant 0 : i32
    return %c0_i32, %c0_i32_0 : i32, i32
  }
  func.func @transform_13(%arg0: i32) -> (i32, i32) {
    %c0_i32 = arith.constant 0 : i32
    %c0_i32_0 = arith.constant 0 : i32
    %c0_i32_1 = arith.constant 0 : i32
    return %c0_i32, %c0_i32_0 : i32, i32
  }
  func.func @transform_14(%arg0: i32) -> (i32, i32) {
    %c0_i32 = arith.constant 0 : i32
    %c0_i32_0 = arith.constant 0 : i32
    %c0_i32_1 = arith.constant 0 : i32
    return %c0_i32, %c0_i32_0 : i32, i32
  }
  func.func @transform_15(%arg0: i32) -> (i32, i32) {
    %c0_i32 = arith.constant 0 : i32
    %c0_i32_0 = arith.constant 0 : i32
    %c0_i32_1 = arith.constant 0 : i32
    return %c0_i32, %c0_i32_0 : i32, i32
  }
  func.func @transform_16(%arg0: i32) -> (i32, i32) {
    %c0_i32 = arith.constant 0 : i32
    %c0_i32_0 = arith.constant 0 : i32
    %c0_i32_1 = arith.constant 0 : i32
    return %c0_i32, %c0_i32_0 : i32, i32
  }
  func.func @transform_17(%arg0: i32) -> (i32, i32) {
    %c0_i32 = arith.constant 0 : i32
    %c0_i32_0 = arith.constant 0 : i32
    %c0_i32_1 = arith.constant 0 : i32
    return %c0_i32, %c0_i32_0 : i32, i32
  }
  func.func @transform_18(%arg0: i32) -> (i32, i32) {
    %c0_i32 = arith.constant 0 : i32
    %c0_i32_0 = arith.constant 0 : i32
    %c0_i32_1 = arith.constant 0 : i32
    return %c0_i32, %c0_i32_0 : i32, i32
  }
  func.func @transform_19(%arg0: i32) -> (i32, i32) {
    %c0_i32 = arith.constant 0 : i32
    %c0_i32_0 = arith.constant 0 : i32
    %c0_i32_1 = arith.constant 0 : i32
    return %c0_i32, %c0_i32_0 : i32, i32
  }
  func.func @transform_20(%arg0: i32) -> (i32, i32) {
    %c0_i32 = arith.constant 0 : i32
    %c0_i32_0 = arith.constant 0 : i32
    %c0_i32_1 = arith.constant 0 : i32
    return %c0_i32, %c0_i32_0 : i32, i32
  }
  func.func @transform_21(%arg0: i32) -> (i32, i32) {
    %c0_i32 = arith.constant 0 : i32
    %c0_i32_0 = arith.constant 0 : i32
    %c0_i32_1 = arith.constant 0 : i32
    return %c0_i32, %c0_i32_0 : i32, i32
  }
  func.func @transform_22(%arg0: i32) -> (i32, i32) {
    %c0_i32 = arith.constant 0 : i32
    %c0_i32_0 = arith.constant 0 : i32
    %c0_i32_1 = arith.constant 0 : i32
    return %c0_i32, %c0_i32_0 : i32, i32
  }
  func.func @transform_23(%arg0: i32) -> (i32, i32, i32) {
    %c0_i32 = arith.constant 0 : i32
    %c0_i32_0 = arith.constant 0 : i32
    %c0_i32_1 = arith.constant 0 : i32
    return %arg0, %c0_i32, %c0_i32_0 : i32, i32, i32
  }
}

</mosaic_0001>

<bundles_post_ra>
// kernel: tpu_custom_call.1
= control target key start
LH: loop header
LB: loop body
LE: loop exit
PB: predicated region body
PF: predicated region fallthrough
CT: control target
= control target key end

     0   :  { %s6385_s0 = inlined_call_operand.hbm [shape: f32[2,8,32], index: 0, kind: input, shape index: {}]   ;;  %s6386_s1 = inlined_call_operand.vmem [shape: f32[2,16,32], index: 1, kind: input, shape index: {}]   ;;  %s6387_s2 = inlined_call_operand.vmem [shape: f32[32,32], index: 2, kind: input, shape index: {}]   ;;  %s6388_s3 = inlined_call_operand.vmem [shape: f32[32,32], index: 3, kind: input, shape index: {}]   ;;  %s6389_s4 = inlined_call_operand.vmem [shape: f32[32,32], index: 4, kind: input, shape index: {}]   ;;  %s6390_s5 = inlined_call_operand.vmem [shape: f32[32,32], index: 5, kind: input, shape index: {}]   ;;  %s6391_s6 = inlined_call_operand.vmem [shape: f32[32,32], index: 6, kind: input, shape index: {}]   ;;  %s6392_s7 = inlined_call_operand.vmem [shape: f32[32,32], index: 7, kind: input, shape index: {}]   ;;  %s6393_s8 = inlined_call_operand.vmem [shape: f32[32,32], index: 8, kind: input, shape index: {}]   ;;  %s6394_s9 = inlined_call_operand.vmem [shape: f32[32,32], index: 9, kind: input, shape index: {}]   ;;  %s6395_s10 = inlined_call_operand.hbm [shape: f32[32,128], index: 10, kind: input, shape index: {}]   ;;  %s6396_s11 = inlined_call_operand.vmem [shape: f32[128,32], index: 11, kind: input, shape index: {}]   ;;  %s6397_s12 = inlined_call_operand.hbm [shape: f32[32,32], index: 12, kind: input, shape index: {}]   ;;  %s6398_s13 = inlined_call_operand.hbm [shape: f32[32,32], index: 13, kind: input, shape index: {}]   ;;  %s6399_s14 = inlined_call_operand.hbm [shape: f32[32,32], index: 14, kind: input, shape index: {}]   ;;  %s6400_s15 = inlined_call_operand.hbm [shape: f32[32,32], index: 15, kind: input, shape index: {}]   ;;  %s6401_s16 = inlined_call_operand.hbm [shape: f32[32,32], index: 16, kind: input, shape index: {}]   ;;  %s6402_s17 = inlined_call_operand.hbm [shape: f32[32,32], index: 17, kind: input, shape index: {}]   ;;  %s6403_s18 = inlined_call_operand.vmem [shape: f32[32,32], index: 18, kind: input, shape index: {}]   ;;  %s6404_s19 = inlined_call_operand.hbm [shape: f32[32,32], index: 19, kind: input, shape index: {}]   ;;  %s6405_s20 = inlined_call_operand.hbm [shape: f32[32,128], index: 20, kind: input, shape index: {}]   ;;  %s6406_s21 = inlined_call_operand.vmem [shape: f32[128,32], index: 21, kind: input, shape index: {}]   ;;  %s6407_s22 = inlined_call_operand.vmem [shape: f32[1,32], index: 22, kind: input, shape index: {}]   ;;  %s6408_s23 = inlined_call_operand.hbm [shape: f32[2,8,32], index: 23, kind: output, shape index: {}]  }
   0x1   :  { %6428 = sst [smem:[#allocation27_spill]] %s6385_s0 }
   0x2   :  { %6429 = sst [smem:[#allocation28_spill]] %s6386_s1 }
   0x3   :  { %6430 = sst [smem:[#allocation29_spill]] %s6387_s2 }
   0x4   :  { %6431 = sst [smem:[#allocation30_spill]] %s6388_s3 }
   0x5   :  { %6432 = sst [smem:[#allocation31_spill]] %s6389_s4 }
   0x6   :  { %6433 = sst [smem:[#allocation32_spill]] %s6390_s5 }
   0x7   :  { %6434 = sst [smem:[#allocation33_spill]] %s6391_s6 }
   0x8   :  { %6435 = sst [smem:[#allocation34_spill]] %s6392_s7 }
   0x9   :  { %6436 = sst [smem:[#allocation35_spill]] %s6395_s10 }
   0xa   :  { %6437 = sst [smem:[#allocation36_spill]] %s6397_s12 }
   0xb   :  { %6438 = sst [smem:[#allocation37_spill]] %s6398_s13 }
   0xc   :  { %6439 = sst [smem:[#allocation38_spill]] %s6399_s14 }
   0xd   :  { %6440 = sst [smem:[#allocation39_spill]] %s6400_s15 }
   0xe   :  { %6441 = sst [smem:[#allocation40_spill]] %s6401_s16 }
   0xf   :  { %6442 = sst [smem:[#allocation41_spill]] %s6402_s17 }
  0x10   :  { %6443 = sst [smem:[#allocation42_spill]] %s6404_s19 }
  0x11   :  { %6444 = sst [smem:[#allocation43_spill]] %s6405_s20 }
  0x12   :  { %6445 = sst [smem:[#allocation44_spill]] %s6407_s22 }
  0x13   :  { %6446 = sst [smem:[#allocation45_spill]] %s6408_s23 }
  0x14   :  { %28 = vsyncpa [#allocation3], 0 }
  0x15   :  { %30 = vsyncpa [#allocation3 + $0x1], 0 }
  0x16   :  { %31 = vsyncpa [#allocation6], 0 }
  0x17   :  { %32 = vsyncpa [#allocation9], 0 }
  0x18   :  { %33 = vsyncpa [#allocation12], 0 }
  0x19   :  { %34 = vsyncpa [#allocation15], 0 }
  0x1a   :  { %35 = vsyncpa [#allocation18], 0 }
  0x1b   :  { %36 = vsyncpa [#allocation4], 0 }
  0x1c   :  { %38 = vsyncpa [#allocation4 + $0x1], 0  ;;  %s5576_s4 = smov 0   ;;  %s5578_s30 = smov 0  }
  0x1d   :  { %s5580_s24 = smov 0   ;;  %s5582_s25 = smov 0  }
  0x1e LB: > { %s5440_s5 = smov [#allocation5]   ;;  %s5597_s26 = sadd.s32 4294967295, %s5438_s25   ;;  %s5438_s25 = sphi %s5582_s25, %s6493_s25   ;;  %s5434_s24 = sphi %s5580_s24, %s6492_s24   ;;  %s5430_s30 = sphi %s5578_s30, %s6491_s30   ;;  %s5426_s4 = sphi %s5576_s4, %s6490_s4  }
  0x1f   : > { %s604_s1 = sshll.u32 %s5440_s5, 4  ;;  %p4281_p0 = scmp.ge.s32.totalorder %s5438_s25, 1  ;;  %s605_s1 = int_to_ptr.vmem [resolvable:$true] %s604_s1 }
  0x20   : > { %p6417_p1 = scmp.eq.s32.totalorder %s5597_s26, 0  ;;  %p568_p2 = scmp.lt.s32.totalorder %s5438_s25, 3 }
  0x21   : > { %s5441_s6 = smov [#allocation8]   ;;  %s5442_s28 = smov [#allocation11]  }
  0x22   : > { %p5602_p3 = pnand %p4281_p0, %p568_p2  ;;  %s633_s27 = sshll.u32 %s5441_s6, 4  ;;  %s5615_s27 = int_to_ptr.vmem [resolvable:$true] %s633_s27 }
  0x23   : > { %s659_s29 = sshll.u32 %s5442_s28, 4  ;;  %s5103_s0 = scalar_lea.vmem %s605_s1, 512  ;;  %s5617_s29 = int_to_ptr.vmem [resolvable:$true] %s659_s29 }
  0x24   : > { %s6447_s2 = scalar_select %p5602_p3, 1, 0 }
  0x25   : > { %p4956_p5 = pneg %p5602_p3  ;;  %p5104_p8 = scmp.ne.s32.totalorder %s605_s1, %s5103_s0 }
  0x26   : > { %p5111_p11 = scmp.lt.s32.totalorder %s605_s1, %s605_s1  ;;  %p5112_p12 = scmp.lt.s32.totalorder %s5103_s0, %s5103_s0 }
  0x27   : > { %p5611_p6 = pnand %p4956_p5, %p6417_p1 }
  0x28   : > { %p5113_p13 = por %p5112_p12, %p5111_p11 }
  0x29   : > { %p5621_p7 = pneg %p5611_p6 }
  0x2b   : > { %p5106_p9 = pnand %p5104_p8, %p5621_p7 }
  0x2d   : > { %p5107_p10 = pneg %p5106_p9 }
  0x2f   : > { %p5114_p0 = pnand %p5113_p13, %p5107_p10 }
  0x31   : > { %5117 = shalt.err (!%p5114_p0)
}
  0x32   : > { %s5443_s5 = smov 128   ;;  %s5444_s6 = smov 8  }
  0x33   : > { %s6450_s10 = sld [smem:[#allocation35_spill]]  ;;  %s5129_s22 = scalar_lea.vmem %s5615_s27, 512 }
  0x34   : > { %p5130_p2 = scmp.ne.s32.totalorder %s5615_s27, %s5129_s22  ;;  %p5137_p9 = scmp.lt.s32.totalorder %s5615_s27, %s5615_s27 }
  0x35   : > { %p5138_p10 = scmp.lt.s32.totalorder %s5129_s22, %s5129_s22 }
  0x36   : > { %p5132_p5 = pnand %p5130_p2, %p5621_p7 }
  0x37   : > { %p5139_p11 = por %p5138_p10, %p5137_p9 }
  0x38   : > { %p5133_p8 = pneg %p5132_p5 }
  0x39   : > { %4959 = dma.hbm_to_vmem [thread:$0]  (!%p5611_p6), %s6450_s10, 512, %s605_s1, [#allocation6], %s5443_s5, %s5443_s5, %s5444_s6  }
  0x3a   : > { %p5140_p12 = pnand %p5139_p11, %p5133_p8 }
  0x3c   : > { %5143 = shalt.err (!%p5140_p12)
}
  0x3d   : > { %s6451_s13 = sld [smem:[#allocation37_spill]]  ;;  %s5155_s1 = scalar_lea.vmem %s5617_s29, 512 }
  0x3e   : > { %p5156_p13 = scmp.ne.s32.totalorder %s5617_s29, %s5155_s1  ;;  %p5163_p5 = scmp.lt.s32.totalorder %s5617_s29, %s5617_s29 }
  0x3f   : > { %p5164_p8 = scmp.lt.s32.totalorder %s5155_s1, %s5155_s1 }
  0x40   : > { %p5158_p0 = pnand %p5156_p13, %p5621_p7 }
  0x41   : > { %p5165_p9 = por %p5164_p8, %p5163_p5 }
  0x42   : > { %p5159_p2 = pneg %p5158_p0 }
  0x43   : > { %4965 = dma.hbm_to_vmem [thread:$0]  (!%p5611_p6), %s6451_s13, 512, %s5615_s27, [#allocation9], %s5443_s5, %s5443_s5, %s5444_s6  }
  0x44   : > { %p5166_p10 = pnand %p5165_p9, %p5159_p2 }
  0x46   : > { %5169 = shalt.err (!%p5166_p10)
}
  0x47   : > { %s6452_s15 = sld [smem:[#allocation39_spill]]  ;;  %s5445_s27 = smov [#allocation14]  }
  0x48   : > { %s685_s0 = sshll.u32 %s5445_s27, 4  ;;  %s5446_s23 = smov [#allocation7]   ;;  %s686_s0 = int_to_ptr.vmem [resolvable:$true] %s685_s0 }
  0x49   : > { %s620_s10 = sshll.u32 %s5446_s23, 4  ;;  %s5181_s1 = scalar_lea.vmem %s686_s0, 512  ;;  %s621_s10 = int_to_ptr.vmem [resolvable:$true] %s620_s10 }
  0x4a   : > { %p5182_p11 = scmp.ne.s32.totalorder %s686_s0, %s5181_s1  ;;  %p5189_p0 = scmp.lt.s32.totalorder %s686_s0, %s686_s0 }
  0x4b   : > { %p5190_p2 = scmp.lt.s32.totalorder %s5181_s1, %s5181_s1 }
  0x4c   : > { %p5184_p12 = pnand %p5182_p11, %p5621_p7 }
  0x4d   : > { %4971 = dma.hbm_to_vmem [thread:$0]  (!%p5611_p6), %s6452_s15, 512, %s5617_s29, [#allocation12], %s5443_s5, %s5443_s5, %s5444_s6  }
  0x4e   : > { %p5185_p13 = pneg %p5184_p12  ;;  %p5191_p5 = por %p5190_p2, %p5189_p0 }
  0x50   : > { %p5192_p8 = pnand %p5191_p5, %p5185_p13 }
  0x52   : > { %5195 = shalt.err (!%p5192_p8)
}
  0x53   : > { %s6453_s17 = sld [smem:[#allocation41_spill]]  ;;  %s5207_s28 = scalar_lea.vmem %s621_s10, 512 }
  0x54   : > { %p5208_p9 = scmp.ne.s32.totalorder %s621_s10, %s5207_s28  ;;  %p5215_p12 = scmp.lt.s32.totalorder %s621_s10, %s621_s10 }
  0x55   : > { %p5216_p0 = scmp.lt.s32.totalorder %s5207_s28, %s5207_s28 }
  0x56   : > { %p5210_p10 = pnand %p5208_p9, %p5621_p7 }
  0x57   : > { %p5217_p13 = por %p5216_p0, %p5215_p12 }
  0x58   : > { %p5211_p11 = pneg %p5210_p10 }
  0x59   : > { %4977 = dma.hbm_to_vmem [thread:$0]  (!%p5611_p6), %s6453_s17, 512, %s686_s0, [#allocation15], %s5443_s5, %s5443_s5, %s5444_s6  }
  0x5a   : > { %p5218_p2 = pnand %p5217_p13, %p5211_p11 }
  0x5c   : > { %5221 = shalt.err (!%p5218_p2)
}
  0x5d   : > { %s6454_s12 = sld [smem:[#allocation36_spill]]  ;;  %s5447_s0 = smov [#allocation10]  }
  0x5e   : > { %s646_s1 = sshll.u32 %s5447_s0, 4  ;;  %s5448_s29 = smov [#allocation13]   ;;  %s647_s1 = int_to_ptr.vmem [resolvable:$true] %s646_s1 }
  0x5f   : > { %s672_s22 = sshll.u32 %s5448_s29, 4  ;;  %s5233_s13 = scalar_lea.vmem %s647_s1, 512  ;;  %s673_s22 = int_to_ptr.vmem [resolvable:$true] %s672_s22 }
  0x60   : > { %p5234_p5 = scmp.ne.s32.totalorder %s647_s1, %s5233_s13  ;;  %p5241_p10 = scmp.lt.s32.totalorder %s647_s1, %s647_s1 }
  0x61   : > { %p5242_p11 = scmp.lt.s32.totalorder %s5233_s13, %s5233_s13 }
  0x62   : > { %p5236_p8 = pnand %p5234_p5, %p5621_p7 }
  0x63   : > { %4962 = dma.hbm_to_vmem [thread:$0]  (!%p5611_p6), %s6454_s12, 512, %s621_s10, [#allocation6], %s5443_s5, %s5443_s5, %s5444_s6  }
  0x64   : > { %p5237_p9 = pneg %p5236_p8  ;;  %p5243_p12 = por %p5242_p11, %p5241_p10 }
  0x66   : > { %p5244_p0 = pnand %p5243_p12, %p5237_p9 }
  0x68   : > { %5247 = shalt.err (!%p5244_p0)
}
  0x69   : > { %s6455_s14 = sld [smem:[#allocation38_spill]]  ;;  %s5259_s27 = scalar_lea.vmem %s673_s22, 512 }
  0x6a   : > { %p5260_p13 = scmp.ne.s32.totalorder %s673_s22, %s5259_s27  ;;  %p5267_p8 = scmp.lt.s32.totalorder %s673_s22, %s673_s22 }
  0x6b   : > { %p5268_p10 = scmp.lt.s32.totalorder %s5259_s27, %s5259_s27 }
  0x6c   : > { %p5262_p2 = pnand %p5260_p13, %p5621_p7 }
  0x6d   : > { %p5269_p9 = por %p5268_p10, %p5267_p8 }
  0x6e   : > { %p5263_p5 = pneg %p5262_p2 }
  0x6f   : > { %4968 = dma.hbm_to_vmem [thread:$0]  (!%p5611_p6), %s6455_s14, 512, %s647_s1, [#allocation9], %s5443_s5, %s5443_s5, %s5444_s6  }
  0x70   : > { %p5270_p11 = pnand %p5269_p9, %p5263_p5 }
  0x72   : > { %5273 = shalt.err (!%p5270_p11)
}
  0x73   : > { %s6456_s16 = sld [smem:[#allocation40_spill]]  ;;  %s5449_s0 = smov [#allocation16]  }
  0x74   : > { %s701_s1 = sshll.u32 %s5449_s0, 4  ;;  %s5450_s29 = smov [#allocation17]   ;;  %s702_s1 = int_to_ptr.vmem [resolvable:$true] %s701_s1 }
  0x75   : > { %s714_s10 = sshll.u32 %s5450_s29, 4  ;;  %s5285_s28 = scalar_lea.vmem %s702_s1, 512  ;;  %s715_s10 = int_to_ptr.vmem [resolvable:$true] %s714_s10 }
  0x76   : > { %p5286_p12 = scmp.ne.s32.totalorder %s702_s1, %s5285_s28  ;;  %p5293_p2 = scmp.lt.s32.totalorder %s702_s1, %s702_s1 }
  0x77   : > { %p5294_p5 = scmp.lt.s32.totalorder %s5285_s28, %s5285_s28 }
  0x78   : > { %p5288_p0 = pnand %p5286_p12, %p5621_p7 }
  0x79   : > { %4974 = dma.hbm_to_vmem [thread:$0]  (!%p5611_p6), %s6456_s16, 512, %s673_s22, [#allocation12], %s5443_s5, %s5443_s5, %s5444_s6  }
  0x7a   : > { %p5289_p13 = pneg %p5288_p0  ;;  %p5295_p8 = por %p5294_p5, %p5293_p2 }
  0x7c   : > { %p5296_p10 = pnand %p5295_p8, %p5289_p13 }
  0x7e   : > { %5299 = shalt.err (!%p5296_p10)
}
  0x7f   : > { %s6457_s19 = sld [smem:[#allocation42_spill]]  ;;  %s5311_s13 = scalar_lea.vmem %s715_s10, 512 }
  0x80   : > { %p5312_p9 = scmp.ne.s32.totalorder %s715_s10, %s5311_s13  ;;  %p5319_p0 = scmp.lt.s32.totalorder %s715_s10, %s715_s10 }
  0x81   : > { %p5320_p2 = scmp.lt.s32.totalorder %s5311_s13, %s5311_s13 }
  0x82   : > { %p5314_p11 = pnand %p5312_p9, %p5621_p7 }
  0x83   : > { %p5321_p13 = por %p5320_p2, %p5319_p0 }
  0x84   : > { %p5315_p12 = pneg %p5314_p11 }
  0x85   : > { %4980 = dma.hbm_to_vmem [thread:$0]  (!%p5611_p6), %s6457_s19, 512, %s702_s1, [#allocation15], %s5443_s5, %s5443_s5, %s5444_s6  }
  0x86   : > { %p5322_p5 = pnand %p5321_p13, %p5315_p12 }
  0x88   : > { %5325 = shalt.err (!%p5322_p5)
}
  0x89   : > { %s6458_s20 = sld [smem:[#allocation43_spill]]  ;;  %s4280_s7 = sadd.s32 4294967294, %s5438_s25  }
  0x8a   : > { %s5727_s3 = sadd.s32 1, %s5438_s25   ;;  %s51_s1 = sadd.s32 1, %s5434_s24 }
  0x8b   : > { %s48_s29 = ssub.s32 %s5438_s25, %s5727_s3  ;;  %p58_p7 = scmp.ne.s32.totalorder %s5434_s24, %s5430_s30 }
  0x8c   : > { %p49_p8 = scmp.eq.s32.totalorder %s48_s29, 0  ;;  %p59_p10 = scmp.eq.s32.totalorder %s5438_s25, 0 }
  0x8d   : > { %p64_p9 = scmp.ne.s32.totalorder %s5430_s30, %s5426_s4  ;;  %p555_p11 = scmp.eq.s32.totalorder %s5597_s26, 1 }
  0x8e   : > { %s5739_s28 = scalar_select %p49_p8, %s5434_s24, %s51_s1  }
  0x8f   : > { %4983 = dma.hbm_to_vmem [thread:$0]  (!%p5611_p6), %s6458_s20, 512, %s715_s10, [#allocation18], %s5443_s5, %s5443_s5, %s5444_s6  }
  0x90   : > { %p60_p12 = por %p59_p10, %p58_p7  ;;  %p5743_p0 = por %p6417_p1, %p64_p9 }
  0x91   : > { %p5747_p6 = por %p555_p11, %p58_p7  ;;  %p561_p2 = scmp.eq.s32.totalorder %s4280_s7, 1 }
  0x92   : > { %s6459_s22 = scalar_select %p5743_p0, 1, 0 }
  0x93   : > { %s6460_s5 = scalar_select %p5747_p6, 1, 0 }
  0x94   : > { %p5001_p13 = scmp.lt.s32.totalorder %s5438_s25, 2  ;;  %s734_s6 = sand.u32 1, %s5434_s24  }
  0x95   : > { %p5753_p5 = por %p561_p2, %p64_p9  ;;  %s4292_s27 = sshll.u32 %s734_s6, 3 }
  0x96   : > { %s4293_s13 = sshll.u32 %s5438_s25, 7  ;;  %s6462_s1 = sld [smem:[#allocation27_spill]] }
  0x97   : > { %s6461_s10 = scalar_select %p5753_p5, 1, 0 }
  0x98   : > { %s738_s12 = scalar_lea.vmem [#allocation2], %s4292_s27  ;;  %p5763_p7 = pnand %p5001_p13, %p60_p12 }
  0x99   : > { %s745_s14 = sshll.u32 %s738_s12, 4  ;;  %s735_s15 = scalar_lea.sflag [#allocation3], %s734_s6  ;;  %s746_s14 = int_to_ptr.vmem [resolvable:$true] %s745_s14 }
  0x9a   : > { %p5328_p10 = pneg %p5763_p7 }
  0x9c   : > { %s5761_s29 = scalar_lea.hbm %s6462_s1, %s4293_s13  ;;  %s5331_s0 = scalar_lea.hbm %s6462_s1, 256 }
  0x9d   : > { %s5326_s16 = scalar_lea.hbm %s5761_s29, 128  ;;  %p5332_p12 = scmp.lt.s32.totalorder %s5761_s29, %s6462_s1 }
  0x9e   : > { %p5327_p8 = scmp.ne.s32.totalorder %s5761_s29, %s5326_s16  ;;  %p5333_p2 = scmp.lt.s32.totalorder %s5331_s0, %s5326_s16 }
  0xa0   : > { %p5329_p9 = pnand %p5328_p10, %p5327_p8  ;;  %p5334_p13 = por %p5333_p2, %p5332_p12 }
  0xa2   : > { %p5330_p11 = pneg %p5329_p9 }
  0xa4   : > { %p5335_p4 = pnand %p5334_p13, %p5330_p11 }
  0xa6   : > { %5338 = shalt.err (!%p5335_p4)
}
  0xa7   : > { %s5339_s12 = scalar_lea.vmem %s746_s14, 128  ;;  %s5451_s6 = smov [#allocation2]  }
  0xa8   : > { %p5340_p1 = scmp.ne.s32.totalorder %s746_s14, %s5339_s12  ;;  %s5344_s19 = sshll.u32 %s5451_s6, 4  ;;  %s5345_s19 = int_to_ptr.vmem [resolvable:$false] %s5344_s19 }
  0xa9   : > { %s5346_s20 = scalar_lea.vmem %s5345_s19, 256  ;;  %p5347_p8 = scmp.lt.s32.totalorder %s746_s14, %s5345_s19 }
  0xaa   : > { %p5342_p5 = pnand %p5340_p1, %p5328_p10  ;;  %p5348_p9 = scmp.lt.s32.totalorder %s5346_s20, %s5339_s12 }
  0xac   : > { %p5343_p6 = pneg %p5342_p5  ;;  %p5349_p0 = por %p5348_p9, %p5347_p8 }
  0xae   : > { %p5350_p3 = pnand %p5349_p0, %p5343_p6 }
  0xb0   : > { %5353 = shalt.err (!%p5350_p3)
}
  0xb1   : > { %4987 = dma.hbm_to_vmem [thread:$0]  (!%p5763_p7), %s5761_s29, 128, %s746_s14, %s735_s15  }
  0xb2   : > { %p6464_p11 = scmp.ne.s32.totalorder %s6447_s2, 0 }
  0xb3   : > { %s5784_s16 = sand.u32 (!%p6464_p11), 1, %s5430_s30   ;;  %p6465_p1 = scmp.ne.s32.totalorder (!%p6464_p11), %s6459_s22, 0 }
  0xb4   : > { %762 = sbr.rel (%p6464_p11) target bundleno = 6012 (0x177c), region = 112  ;;  %s6421_s17 = sshll.u32 (!%p6464_p11), %s5784_s16, 3 }
  0xb5   : > { %s765_s19 = scalar_lea.sflag (!%p6464_p11), [#allocation3], %s5784_s16  ;;  %s768_s20 = scalar_lea.vmem (!%p6464_p11), [#allocation2], %s6421_s17 }
  0xb9   : > { %5397 = dma.done.wait (%p6465_p1), %s765_s19, 128  }
  0xba   : > { %5399 = vsyncadd (%p6465_p1), %s765_s19, 4294967168  ;;  %p6466_p3 = scmp.eq.s32.totalorder %s5597_s26, 0 }
  0xbc   : > { %5401 = dma.done.wait (%p6466_p3), [#allocation6], 1024   ;;  %p6467_p4 = pmov %p6466_p3 }
  0xbd   : > { %p6468_p0 = pmov %p6466_p3 }
  0xbe   : > { %5403 = vsyncadd (%p6467_p4), [#allocation6], 4294966272 }
  0xbf   : > { %5405 = dma.done.wait (%p6468_p0), [#allocation9], 1024   ;;  %p6469_p6 = pmov %p6468_p0 }
  0xc0   : > { %p6470_p5 = pmov %p6468_p0 }
  0xc1   : > { %5407 = vsyncadd (%p6469_p6), [#allocation9], 4294966272 }
  0xc2   : > { %5409 = dma.done.wait (%p6470_p5), [#allocation12], 1024   ;;  %p6471_p7 = pmov %p6468_p0 }
  0xc3   : > { %p6472_p10 = pmov %p6468_p0 }
  0xc4   : > { %5411 = vsyncadd (%p6471_p7), [#allocation12], 4294966272 }
  0xc5   : > { %5413 = dma.done.wait (%p6472_p10), [#allocation15], 1024   ;;  %p6473_p12 = pmov %p6468_p0 }
  0xc6   : > { %p6474_p2 = pmov %p6468_p0 }
  0xc7   : > { %5415 = vsyncadd (%p6473_p12), [#allocation15], 4294966272 }
  0xc8   : > { %5417 = dma.done.wait (%p6474_p2), [#allocation18], 512   ;;  %p6475_p13 = pmov %p6468_p0 }
  0xc9   : > { %v5452_v0 = vmov 0.0   ;;  %vm5453_vm0 = vmmov 0   ;;  %s6476_s2 = sld [smem:[#allocation29_spill]]  ;;  %v5834_v5 = vld [vmem:[%s768_s20] sm:$0xff]  ;;  %vm889_vm1 = vcmask 261120   ;;  %vm1112_vm2 = vcmask 130048  }
  0xca   : > { %5419 = vsyncadd (%p6475_p13), [#allocation18], 4294966784  ;;  %4540 = vmatprep.subr.mxu0 %v5452_v0  ;;  %4548 = vmatprep.mubr.msk.f32.mxu0 %vm5453_vm0, %v5452_v0  ;;  %s6477_s6 = sld [smem:[#allocation30_spill]]  ;;  %s6422_s15 = smov 112   ;;  %v880_v23 = vlaneseq  ;;  %vm1190_vm4 = vcmask 64512  }
  0xcb   : > { %4578 = vmatprep.subr.mxu1 %v5452_v0  ;;  %4580 = vmatprep.mubr.msk.f32.mxu1 %vm5453_vm0, %v5452_v0  ;;  %s6478_s23 = sld [smem:[#allocation31_spill]]  ;;  %p872_p8 = scmp.lt.s32.totalorder %s5597_s26, 1 }
  0xcc   : > { %v5895_v24 = vshrl.u32 %v880_v23, 7  ;;  %v5897_v25 = vand.u32 127, %v880_v23  ;;  %s6479_s7 = sld [smem:[#allocation32_spill]]  ;;  %p6487_p11 = scmp.ne.s32.totalorder %s6460_s5, 0 }
  0xcd   : > { %s6480_s29 = sld [smem:[#allocation34_spill]]  ;;  %s5455_s14 = smov [#allocation19]  }
  0xce   : > { %vm884_vm3 = vcmp.gt.s32.totalorder %v5897_v25, %v5895_v24  ;;  %s873_s19 = scalar_select %p872_p8, %s5597_s26, 1 }
  0xcf   : > { %v888_v1 = vld [vmem:[%s6476_s2 + $0x18] sm:$0xff]  ;;  %v887_v2 = vld [vmem:[%s6476_s2 + $0x10] sm:$0xff]  ;;  %v886_v3 = vld [vmem:[%s6476_s2 + $0x8] sm:$0xff]  ;;  %s6481_s13 = sld [smem:[#allocation28_spill]] }
  0xd0   : > { %4541 = vmatpush3.msra.mxu0 %v888_v1  ;;  %v885_v4 = vld [vmem:[%s6476_s2] sm:$0xff]  ;;  %v967_v6 = vld [vmem:[%s6477_s6 + $0x18] sm:$0xff]  ;;  %v966_v7 = vld [vmem:[%s6477_s6 + $0x10] sm:$0xff]  ;;  %s4367_s20 = sshll.u32 %s873_s19, 4  ;;  %s6482_s27 = sld [smem:[#allocation33_spill]] }
  0xd1   : > { %4542 = vmatprep.subr.mxu0 %v5452_v0  ;;  %v965_v8 = vld [vmem:[%s6477_s6 + $0x8] sm:$0xff]  ;;  %v964_v9 = vld [vmem:[%s6477_s6] sm:$0xff]  ;;  %v1041_v10 = vld [vmem:[%s6478_s23 + $0x18] sm:$0xff]  ;;  %s6484_s22 = sld [smem:[#allocation44_spill]]  ;;  %s4099_s6 = scalar_lea.sflag [#allocation4], %s5784_s16 }
  0xd2   : > { %4543 = vmatpush3.msra.mxu0 %v887_v2  ;;  %v1040_v11 = vld [vmem:[%s6478_s23 + $0x10] sm:$0xff]  ;;  %v1039_v12 = vld [vmem:[%s6478_s23 + $0x8] sm:$0xff]  ;;  %v1038_v13 = vld [vmem:[%s6478_s23] sm:$0xff]  ;;  %s6486_s1 = sld [smem:[#allocation45_spill]] }
  0xd3   : > { %4544 = vmatprep.subr.mxu0 %v5452_v0  ;;  %v1445_v47 = vld [vmem:[%s6479_s7 + $0x18] sm:$0xff]  ;;  %v1276_v52 = vld [vmem:[%s6479_s7 + $0x8] sm:$0xff]  ;;  %v1275_v53 = vld [vmem:[%s6479_s7] sm:$0xff] }
  0xd4   : > { %4545 = vmatpush3.msra.mxu0 %v886_v3  ;;  %v1444_v54 = vld [vmem:[%s6479_s7 + $0x10] sm:$0xff]  ;;  %v1674_v57 = vld [vmem:[%s6480_s29 + $0x18] sm:$0xff]  ;;  %v1672_v59 = vld [vmem:[%s6480_s29 + $0x8] sm:$0xff] }
  0xd5   : > { %4546 = vmatprep.subr.mxu0 %v5452_v0  ;;  %v1673_v58 = vld [vmem:[%s6480_s29 + $0x10] sm:$0xff]  ;;  %v1671_v60 = vld [vmem:[%s6480_s29] sm:$0xff]  ;;  %s876_s0 = scalar_lea.vmem %s6481_s13, %s4367_s20  ;;  %s4364_s13 = sshll.u32 %s5597_s26, 7 }
  0xd6   : > { %4547 = vmatpush3.msra.mxu0 %v885_v4  ;;  %v5952_v61 = vld [vmem:[%s876_s0] sm:$0xff]  ;;  %v5954_v62 = vld [vmem:[%s876_s0 + $0x8] sm:$0xff]  ;;  %v1596_v63 = vld [vmem:[%s6482_s27 + $0x18] sm:$0xff]  ;;  %s6483_s0 = smov 112   ;;  %s5358_s26 = sshll.u32 %s5455_s14, 4  ;;  %s5359_s26 = int_to_ptr.vmem [resolvable:$false] %s5358_s26 }
  0xd7   : > { %4549 = vmatmul.mubr.msk.f32.vlgmr.msra.gmra.mxu0 %vm889_vm1, %v5834_v5  ;;  %4551 = vmatprep.subr.mxu0 %v5452_v0  ;;  %v1595_v3 = vld [vmem:[%s6482_s27 + $0x10] sm:$0xff]  ;;  %v1594_v4 = vld [vmem:[%s6482_s27 + $0x8] sm:$0xff]  ;;  %s5360_s20 = scalar_lea.vmem %s5359_s26, 256 }
  0xd8   : > { %4552 = vmatpush3.msra.mxu0 %v967_v6  ;;  %4559 = vmatprep.mubr.msk.f32.mxu0 %vm5453_vm0, %v5452_v0  ;;  %v1593_v6 = vld [vmem:[%s6482_s27] sm:$0xff]  ;;  %s4110_s2 = scalar_lea.hbm %s6486_s1, %s4364_s13 }
  0xd9   : > { %4553 = vmatprep.subr.mxu0 %v5452_v0 }
  0xda   : > { %4554 = vmatpush3.msra.mxu0 %v966_v7 }
  0xdb   : > { %4555 = vmatprep.subr.mxu0 %v5452_v0 }
  0xdc   : > { %4556 = vmatpush3.msra.mxu0 %v965_v8 }
  0xdd   : > { %4557 = vmatprep.subr.mxu0 %v5452_v0 }
  0xde   : > { %4558 = vmatpush3.msra.mxu0 %v964_v9 }
  0xdf   : > { %4560 = vmatmul.mubr.msk.f32.vlgmr.msra.gmra.mxu0 %vm889_vm1, %v5834_v5  ;;  %4562 = vmatprep.subr.mxu0 %v5452_v0 }
  0xe0   : > { %4570 = vmatprep.mubr.msk.f32.mxu0 %vm5453_vm0, %v5452_v0  ;;  %4563 = vmatpush3.msra.mxu0 %v1041_v10 }
  0xe1   : > { %4564 = vmatprep.subr.mxu0 %v5452_v0 }
  0xe2   : > { %4565 = vmatpush3.msra.mxu0 %v1040_v11 }
  0xe3   : > { %4566 = vmatprep.subr.mxu0 %v5452_v0 }
  0xe4   : > { %4567 = vmatpush3.msra.mxu0 %v1039_v12 }
  0xe5   : > { %4568 = vmatprep.subr.mxu0 %v5452_v0 }
  0xe6   : > { %4569 = vmatpush3.msra.mxu0 %v1038_v13 }
  0xe7   : > { %4571 = vmatmul.mubr.msk.f32.vlgmr.msra.gmra.mxu0 %vm889_vm1, %v5834_v5  ;;  %4573 = vmatprep.subr.mxu0 %v5452_v0 }
  0xe8   : > { %4575 = vmatprep.mubr.msk.f32.mxu0 %vm5453_vm0, %v5452_v0 }
 0x197   : > { %v959_v14 = vpop.f32.mrf.mxu0 }
 0x198   : > { %v963_v17 = vmul.f32 0.25, %v959_v14 }
 0x199   : > { %v4550_v15 = vpop.f32.mrf.mxu0 }
 0x19a   : > { %v1759_v15 = vld [vmem:[%s6393_s8 + $0x18] sm:$0xff] }
 0x19f   : > { %v1034_v16 = vpop.f32.mrf.mxu0 }
 0x1a0   : > { %1279 = vrot.lane.b32.xlu0 %v1034_v16, %s6422_s15  ;;  %4574 = vmatpush3.xpose.msk.msra.mxu0 %vm1112_vm2, %v1034_v16  ;;  %v1758_v16 = vld [vmem:[%s6393_s8 + $0x10] sm:$0xff] }
 0x1a1   : > { %v4561_v18 = vpop.f32.mrf.mxu0  ;;  %4583 = vmatprep.subr.mxu0 %v5452_v0 }
 0x1a3   : > { %4576 = vmatmul.mubr.msk.f32.vlgmr.msra.gmra.mxu0 %vm1112_vm2, %v963_v17 }
 0x1a4   : > { %1277 = vrot.lane.b32.xlu0 %v963_v17, %s6422_s15  ;;  %4585 = vmatprep.mubr.msk.f32.mxu0 %vm5453_vm0, %v5452_v0  ;;  %v1756_v17 = vld [vmem:[%s6393_s8] sm:$0xff] }
 0x1a7   : > { %v1108_v19 = vpop.f32.mrf.mxu0 }
 0x1a8   : > { %4579 = vmatpush3.msra.mxu1 %v1108_v19 }
 0x1a9   : > { %v4572_v20 = vpop.f32.mrf.mxu0  ;;  %4588 = vmatprep.subr.mxu1 %v5452_v0 }
 0x212   : > { %v1280_v21 = vpop.permute.xlu0 %1279 }
 0x213   : > { %4584 = vmatpush3.xpose.msk.msra.mxu0 %vm1112_vm2, %v1280_v21 }
 0x214   : > { %4593 = vmatprep.subr.mxu0 %v5452_v0 }
 0x216   : > { %v1278_v22 = vpop.permute.xlu0 %1277 }
 0x217   : > { %4586 = vmatmul.mubr.msk.f32.vlgmr.msra.gmra.mxu0 %vm1112_vm2, %v1278_v22 }
 0x218   : > { %4597 = vmatprep.mubr.msk.f32.mxu0 %vm5453_vm0, %v5452_v0  ;;  %4594 = vmatpush3.msra.mxu0 %v1445_v47 }
 0x219   : > { %4595 = vmatprep.subr.mxu0 %v5452_v0 }
 0x21a   : > { %4596 = vmatpush3.msra.mxu0 %v1444_v54  ;;  %v2175_v54 = vld [vmem:[%s6394_s9 + $0x18] sm:$0xff] }
 0x21b   : > { %4607 = vmatprep.subr.mxu0 %v5452_v0 }
 0x263   : > { %v1185_v26 = vpop.f32.mrf.mxu0 }
 0x264   : > { %v1189_v27 = vsel %vm884_vm3, -3.4028235e+38, %v1185_v26 }
 0x265   : > { %v4577_v28 = vpop.f32.mrf.mxu0  ;;  %v1191_v29 = vsel %vm1190_vm4, %v1189_v27, -inf }
 0x266   : > { %1192 = vmax.xlane.f32.xlu1 %v1191_v29 }
 0x2d7   : > { %v1351_v30 = vpop.f32.mrf.mxu0 }
 0x2d8   : > { %v1355_v31 = vsel %vm884_vm3, -3.4028235e+38, %v1351_v30 }
 0x2d9   : > { %v4587_v32 = vpop.f32.mrf.mxu0  ;;  %v1356_v33 = vsel %vm1190_vm4, %v1355_v31, -inf }
 0x2da   : > { %1357 = vmax.xlane.f32.xlu1 %v1356_v33 }
 0x2ef   : > { %v1193_v34 = vpop.xlane.xlu1 %1192 }
 0x2f0   : > { %v1194_v35 = vsub.f32 %v1189_v27, %v1193_v34 }
 0x2f2   : > { %v1195_v36 = vmul.f32 1.442695, %v1194_v35 }
 0x2f4   : > { %5058 = vpow2.f32 %v1195_v36 }
 0x301   : > { %v5059_v37 = vpop.eup %5058 }
 0x302   : > { %v1197_v38 = vsel %vm1190_vm4, %v5059_v37, 0.0 }
 0x303   : > { %1198 = vadd.xlane.f32.xlu0 %v1197_v38 }
 0x363   : > { %v1358_v39 = vpop.xlane.xlu1 %1357 }
 0x364   : > { %v1359_v40 = vsub.f32 %v1355_v31, %v1358_v39 }
 0x366   : > { %v1360_v41 = vmul.f32 1.442695, %v1359_v40 }
 0x368   : > { %5060 = vpow2.f32 %v1360_v41 }
 0x375   : > { %v5061_v42 = vpop.eup %5060 }
 0x376   : > { %v1362_v43 = vsel %vm1190_vm4, %v5061_v42, 0.0 }
 0x377   : > { %1363 = vadd.xlane.f32.xlu1 %v1362_v43 }
 0x388   : > { %1368 = vrot.lane.b32.xlu1 %v1108_v19, %s6422_s15 }
 0x38c   : > { %v1199_v44 = vpop.xlane.xlu0 %1198 }
 0x38d   : > { %5062 = vrcp.f32 %v1199_v44 }
 0x39a   : > { %v5063_v45 = vpop.eup %5062 }
 0x39b   : > { %v1201_v46 = vmul.f32 %v5063_v45, %v5059_v37 }
 0x39d   : > { %4581 = vmatmul.mubr.msk.f32.vlgmr.msra.gmra.mxu1 %vm1190_vm4, %v1201_v46  ;;  %v1999_v46 = vld [vmem:[%s6394_s9 + $0x8] sm:$0xff] }
 0x39e   : > { %4590 = vmatprep.mubr.msk.f32.mxu1 %vm5453_vm0, %v5452_v0 }
 0x400   : > { %v1364_v48 = vpop.xlane.xlu1 %1363 }
 0x401   : > { %5064 = vrcp.f32 %v1364_v48 }
 0x404   : > { %v1369_v49 = vpop.permute.xlu1 %1368 }
 0x405   : > { %4589 = vmatpush3.msra.mxu1 %v1369_v49  ;;  %v1998_v49 = vld [vmem:[%s6394_s9] sm:$0xff] }
 0x406   : > { %4600 = vmatprep.subr.mxu1 %v5452_v0 }
 0x40e   : > { %v5065_v50 = vpop.eup %5064 }
 0x40f   : > { %v1366_v51 = vmul.f32 %v5065_v50, %v5061_v42 }
 0x411   : > { %4591 = vmatmul.mubr.msk.f32.vlgmr.msra.gmra.mxu1 %vm1190_vm4, %v1366_v51 }
 0x412   : > { %4601 = vmatpush3.msra.mxu1 %v1276_v52  ;;  %4604 = vmatprep.mubr.msk.f32.mxu1 %vm5453_vm0, %v5452_v0 }
 0x413   : > { %4602 = vmatprep.subr.mxu1 %v5452_v0 }
 0x414   : > { %4603 = vmatpush3.msra.mxu1 %v1275_v53 }
 0x415   : > { %4618 = vmatprep.subr.mxu1 %v1674_v57 }
 0x45d   : > { %v1271_v55 = vpop.f32.mrf.mxu1 }
 0x45e   : > { %4605 = vmatmul.mubr.msk.f32.vlgmr.msra.gmra.mxu1 %vm1112_vm2, %v1271_v55  ;;  %v2174_v55 = vld [vmem:[%s6394_s9 + $0x10] sm:$0xff] }
 0x45f   : > { %v4582_v56 = vpop.f32.mrf.mxu1  ;;  %4619 = vmatpush3.msra.mxu1 %v1674_v57  ;;  %4626 = vmatprep.mubr.msk.f32.mxu1 %vm889_vm1, %v5952_v61 }
 0x460   : > { %4620 = vmatprep.subr.mxu1 %v1673_v58 }
 0x461   : > { %4621 = vmatpush3.msra.mxu1 %v1673_v58  ;;  %v2326_v58 = vld [vmem:[#allocation5 + $0x18] sm:$0xff] }
 0x462   : > { %4622 = vmatprep.subr.mxu1 %v1672_v59 }
 0x463   : > { %4623 = vmatpush3.msra.mxu1 %v1672_v59 }
 0x464   : > { %4624 = vmatprep.subr.mxu1 %v1671_v60 }
 0x465   : > { %4625 = vmatpush3.msra.mxu1 %v1671_v60 }
 0x466   : > { %4627 = vmatmul.mubr.msk.f32.vlgmr.msra.gmra.mxu1 %vm889_vm1, %v5954_v62  ;;  %4640 = vmatprep.subr.mxu1 %v5452_v0 }
 0x467   : > { %4644 = vmatprep.mubr.msk.f32.mxu1 %vm5453_vm0, %v5452_v0 }
 0x4d1   : > { %v1440_v1 = vpop.f32.mrf.mxu1 }
 0x4d2   : > { %4598 = vmatmul.mubr.msk.f32.vlgmr.msra.gmra.mxu0 %vm1112_vm2, %v1440_v1  ;;  %v2324_v1 = vld [vmem:[#allocation5 + $0x8] sm:$0xff] }
 0x4d3   : > { %v4592_v2 = vpop.f32.mrf.mxu1  ;;  %4608 = vmatpush3.msra.mxu0 %v1596_v63  ;;  %4615 = vmatprep.mubr.msk.f32.mxu0 %vm5453_vm0, %v5452_v0  ;;  %v2325_v63 = vld [vmem:[#allocation5 + $0x10] sm:$0xff] }
 0x4d4   : > { %4609 = vmatprep.subr.mxu0 %v5452_v0  ;;  %v2323_v2 = vld [vmem:[#allocation5] sm:$0xff] }
 0x4d5   : > { %4610 = vmatpush3.msra.mxu0 %v1595_v3  ;;  %v2416_v3 = vld [vmem:[%s6396_s11 + $0x78] sm:$0xff] }
 0x4d6   : > { %4611 = vmatprep.subr.mxu0 %v5452_v0 }
 0x4d7   : > { %4612 = vmatpush3.msra.mxu0 %v1594_v4  ;;  %v2415_v4 = vld [vmem:[%s6396_s11 + $0x70] sm:$0xff] }
 0x4d8   : > { %4613 = vmatprep.subr.mxu0 %v5452_v0 }
 0x4d9   : > { %4614 = vmatpush3.msra.mxu0 %v1593_v6  ;;  %v2414_v6 = vld [vmem:[%s6396_s11 + $0x68] sm:$0xff] }
 0x4da   : > { %4629 = vmatprep.subr.mxu0 %v1759_v15 }
 0x51e   : > { %v1588_v7 = vpop.f32.mrf.mxu1 }
 0x520   : > { %v4606_v8 = vpop.f32.mrf.mxu1 }
 0x521   : > { %v2412_v8 = vld [vmem:[%s6396_s11 + $0x58] sm:$0xff] }
 0x526   : > { %v4628_v9 = vpop.f32.mrf.mxu1 }
 0x527   : > { %2004 = vrot.lane.b32.xlu1 %v4628_v9, %s6483_s0  ;;  %4641 = vmatpush3.xpose.msk.msra.mxu1 %vm1112_vm2, %v4628_v9 }
 0x528   : > { %v1747_v10 = vpop.f32.mrf.mxu1  ;;  %4642 = vmatprep.subr.mxu1 %v5452_v0 }
 0x52b   : > { %2002 = vrot.lane.b32.xlu1 %v1747_v10, %s6483_s0  ;;  %4643 = vmatpush3.xpose.msk.msra.mxu1 %vm1112_vm2, %v1747_v10  ;;  %v2411_v10 = vld [vmem:[%s6396_s11 + $0x50] sm:$0xff] }
 0x52c   : > { %4654 = vmatprep.subr.mxu1 %v5452_v0 }
 0x592   : > { %v1515_v11 = vpop.f32.mrf.mxu0 }
 0x593   : > { %v1589_v12 = vadd.f32 %v1588_v7, %v1515_v11  ;;  %v2413_v7 = vld [vmem:[%s6396_s11 + $0x60] sm:$0xff] }
 0x594   : > { %v4599_v13 = vpop.f32.mrf.mxu0 }
 0x595   : > { %v5988_v14 = vadd.f32 %v1589_v12, %v5834_v5  ;;  %v1757_v5 = vld [vmem:[%s6393_s8 + $0x8] sm:$0xff]  ;;  %v2409_v13 = vld [vmem:[%s6396_s11 + $0x40] sm:$0xff] }
 0x596   : > { %v2410_v12 = vld [vmem:[%s6396_s11 + $0x48] sm:$0xff] }
 0x597   : > { %4616 = vmatmul.mubr.msk.f32.vlgmr.msra.gmra.mxu0 %vm889_vm1, %v5988_v14 }
 0x598   : > { %4637 = vmatprep.mubr.msk.f32.mxu0 %vm889_vm1, %v5952_v61  ;;  %4630 = vmatpush3.msra.mxu0 %v1759_v15  ;;  %v2408_v15 = vld [vmem:[%s6396_s11 + $0x38] sm:$0xff] }
 0x599   : > { %4631 = vmatprep.subr.mxu0 %v1758_v16  ;;  %v2005_v18 = vpop.permute.xlu1 %2004 }
 0x59a   : > { %4632 = vmatpush3.msra.mxu0 %v1758_v16  ;;  %v2407_v16 = vld [vmem:[%s6396_s11 + $0x30] sm:$0xff] }
 0x59b   : > { %4633 = vmatprep.subr.mxu0 %v1757_v5 }
 0x59c   : > { %4634 = vmatpush3.msra.mxu0 %v1757_v5  ;;  %v2406_v5 = vld [vmem:[%s6396_s11 + $0x28] sm:$0xff] }
 0x59d   : > { %4635 = vmatprep.subr.mxu0 %v1756_v17  ;;  %v2003_v22 = vpop.permute.xlu1 %2002 }
 0x59e   : > { %4636 = vmatpush3.msra.mxu0 %v1756_v17  ;;  %v2405_v17 = vld [vmem:[%s6396_s11 + $0x20] sm:$0xff] }
 0x59f   : > { %4638 = vmatmul.mubr.msk.f32.vlgmr.msra.gmra.mxu0 %vm889_vm1, %v5954_v62  ;;  %4647 = vmatprep.subr.mxu0 %v5452_v0 }
 0x5a0   : > { %4651 = vmatprep.mubr.msk.f32.mxu0 %vm5453_vm0, %v5452_v0 }
 0x657   : > { %v1666_v19 = vpop.f32.mrf.mxu0 }
 0x658   : > { %v1670_v20 = vmul.f32 0.25, %v1666_v19  ;;  %v2403_v19 = vld [vmem:[%s6396_s11 + $0x10] sm:$0xff] }
 0x659   : > { %v4617_v21 = vpop.f32.mrf.mxu0 }
 0x65a   : > { %2000 = vrot.lane.b32.xlu1 %v1670_v20, %s6483_s0  ;;  %4645 = vmatmul.mubr.msk.f32.vlgmr.msra.gmra.mxu1 %vm1112_vm2, %v1670_v20 }
 0x65b   : > { %4655 = vmatpush3.xpose.msk.msra.mxu1 %vm1112_vm2, %v2005_v18  ;;  %4658 = vmatprep.mubr.msk.f32.mxu1 %vm5453_vm0, %v5452_v0  ;;  %v2404_v18 = vld [vmem:[%s6396_s11 + $0x18] sm:$0xff] }
 0x65c   : > { %4656 = vmatprep.subr.mxu1 %v5452_v0 }
 0x65f   : > { %4657 = vmatpush3.xpose.msk.msra.mxu1 %vm1112_vm2, %v2003_v22  ;;  %v4639_v26 = vpop.f32.mrf.mxu0 }
 0x660   : > { %4675 = vmatprep.subr.mxu1 %v5452_v0  ;;  %4648 = vmatpush3.msra.mxu0 %v4639_v26 }
 0x661   : > { %4649 = vmatprep.subr.mxu0 %v5452_v0  ;;  %v1826_v30 = vpop.f32.mrf.mxu0 }
 0x662   : > { %4650 = vmatpush3.msra.mxu0 %v1826_v30 }
 0x663   : > { %4661 = vmatprep.subr.mxu0 %v5452_v0 }
 0x6cc   : > { %v2001_v23 = vpop.permute.xlu1 %2000 }
 0x6cd   : > { %4659 = vmatmul.mubr.msk.f32.vlgmr.msra.gmra.mxu1 %vm1112_vm2, %v2001_v23 }
 0x6ce   : > { %4679 = vmatprep.mubr.msk.f32.mxu1 %vm5453_vm0, %v5452_v0  ;;  %4676 = vmatpush3.msra.mxu1 %v1999_v46 }
 0x6cf   : > { %4677 = vmatprep.subr.mxu1 %v5452_v0 }
 0x6d0   : > { %4678 = vmatpush3.msra.mxu1 %v1998_v49 }
 0x6d1   : > { %4693 = vmatprep.subr.mxu1 %v5452_v0 }
 0x71a   : > { %v1910_v27 = vpop.f32.mrf.mxu1 }
 0x71b   : > { %v1914_v28 = vsel %vm1112_vm2, %v1910_v27, -inf }
 0x71c   : > { %1915 = vmax.xlane.f32.xlu0 %v1914_v28  ;;  %v4646_v29 = vpop.f32.mrf.mxu1  ;;  %v2490_v28 = vld [vmem:[#allocation7 + $0x18] sm:$0xff] }
 0x71d   : > { %v2489_v29 = vld [vmem:[#allocation7 + $0x10] sm:$0xff] }
 0x732   : > { %2097 = vrot.lane.b32.xlu0 %v4639_v26, %s6483_s0  ;;  %v2402_v26 = vld [vmem:[%s6396_s11 + $0x8] sm:$0xff] }
 0x78d   : > { %v2078_v31 = vpop.f32.mrf.mxu1 }
 0x78e   : > { %v2082_v32 = vsel %vm1112_vm2, %v2078_v31, -inf }
 0x78f   : > { %2083 = vmax.xlane.f32.xlu1 %v2082_v32  ;;  %v4660_v33 = vpop.f32.mrf.mxu1 }
 0x790   : > { %v2487_v33 = vld [vmem:[#allocation7] sm:$0xff] }
 0x7a5   : > { %v1916_v34 = vpop.xlane.xlu0 %1915 }
 0x7a6   : > { %v1917_v35 = vsub.f32 %v1910_v27, %v1916_v34  ;;  %v2401_v27 = vld [vmem:[%s6396_s11] sm:$0xff] }
 0x7a8   : > { %v1918_v36 = vmul.f32 1.442695, %v1917_v35 }
 0x7a9   : > { %v2098_v44 = vpop.permute.xlu0 %2097 }
 0x7aa   : > { %5066 = vpow2.f32 %v1918_v36  ;;  %v2568_v36 = vld [vmem:[#allocation8 + $0x18] sm:$0xff] }
 0x7b7   : > { %v5067_v37 = vpop.eup %5066 }
 0x7b8   : > { %v1920_v38 = vsel %vm1112_vm2, %v5067_v37, 0.0 }
 0x7b9   : > { %1921 = vadd.xlane.f32.xlu0 %v1920_v38  ;;  %v2567_v38 = vld [vmem:[#allocation8 + $0x10] sm:$0xff] }
 0x818   : > { %v2084_v39 = vpop.xlane.xlu1 %2083 }
 0x819   : > { %v2085_v40 = vsub.f32 %v2078_v31, %v2084_v39  ;;  %v2566_v39 = vld [vmem:[#allocation8 + $0x8] sm:$0xff] }
 0x81b   : > { %v2086_v41 = vmul.f32 1.442695, %v2085_v40  ;;  %v2565_v40 = vld [vmem:[#allocation8] sm:$0xff] }
 0x81d   : > { %5068 = vpow2.f32 %v2086_v41  ;;  %v2642_v41 = vld [vmem:[#allocation10 + $0x18] sm:$0xff] }
 0x82a   : > { %v5069_v42 = vpop.eup %5068 }
 0x82b   : > { %v2088_v43 = vsel %vm1112_vm2, %v5069_v42, 0.0 }
 0x82c   : > { %2089 = vadd.xlane.f32.xlu0 %v2088_v43  ;;  %v2640_v43 = vld [vmem:[#allocation10 + $0x8] sm:$0xff] }
 0x842   : > { %v1922_v45 = vpop.xlane.xlu0 %1921  ;;  %2095 = vrot.lane.b32.xlu0 %v1826_v30, %s6483_s0 }
 0x843   : > { %5070 = vrcp.f32 %v1922_v45 }
 0x850   : > { %v5071_v47 = vpop.eup %5070 }
 0x851   : > { %v1924_v48 = vmul.f32 %v5071_v47, %v5067_v37 }
 0x853   : > { %4652 = vmatmul.mubr.msk.f32.vlgmr.msra.gmra.mxu0 %vm1112_vm2, %v1924_v48 }
 0x854   : > { %4662 = vmatpush3.msra.mxu0 %v2098_v44  ;;  %4665 = vmatprep.mubr.msk.f32.mxu0 %vm5453_vm0, %v5452_v0  ;;  %v2639_v44 = vld [vmem:[#allocation10] sm:$0xff] }
 0x855   : > { %4663 = vmatprep.subr.mxu0 %v5452_v0 }
 0x8b5   : > { %v2090_v50 = vpop.xlane.xlu0 %2089 }
 0x8b6   : > { %5072 = vrcp.f32 %v2090_v50 }
 0x8b9   : > { %v2096_v51 = vpop.permute.xlu0 %2095 }
 0x8ba   : > { %4664 = vmatpush3.msra.mxu0 %v2096_v51 }
 0x8bb   : > { %4668 = vmatprep.subr.mxu0 %v5452_v0 }
 0x8c3   : > { %v5073_v52 = vpop.eup %5072 }
 0x8c4   : > { %v2092_v53 = vmul.f32 %v5073_v52, %v5069_v42  ;;  %v2641_v42 = vld [vmem:[#allocation10 + $0x10] sm:$0xff] }
 0x8c6   : > { %4666 = vmatmul.mubr.msk.f32.vlgmr.msra.gmra.mxu0 %vm1112_vm2, %v2092_v53 }
 0x8c7   : > { %4669 = vmatpush3.msra.mxu0 %v2175_v54  ;;  %4672 = vmatprep.mubr.msk.f32.mxu0 %vm5453_vm0, %v5452_v0 }
 0x8c8   : > { %4670 = vmatprep.subr.mxu0 %v5452_v0 }
 0x8c9   : > { %4671 = vmatpush3.msra.mxu0 %v2174_v55 }
 0x8ca   : > { %4682 = vmatprep.subr.mxu0 %v5452_v0 }
 0x913   : > { %v1994_v56 = vpop.f32.mrf.mxu0 }
 0x914   : > { %4680 = vmatmul.mubr.msk.f32.vlgmr.msra.gmra.mxu1 %vm1112_vm2, %v1994_v56 }
 0x915   : > { %v4653_v57 = vpop.f32.mrf.mxu0  ;;  %4725 = vmatprep.mubr.msk.f32.mxu1 %vm5453_vm0, %v5452_v0  ;;  %4694 = vmatpush3.msra.mxu1 %v2416_v3 }
 0x916   : > { %4695 = vmatprep.subr.mxu1 %v5452_v0 }
 0x917   : > { %4696 = vmatpush3.msra.mxu1 %v2415_v4 }
 0x918   : > { %4697 = vmatprep.subr.mxu1 %v5452_v0 }
 0x919   : > { %4698 = vmatpush3.msra.mxu1 %v2414_v6 }
 0x91a   : > { %4699 = vmatprep.subr.mxu1 %v5452_v0 }
 0x91b   : > { %4700 = vmatpush3.msra.mxu1 %v2413_v7 }
 0x91c   : > { %4701 = vmatprep.subr.mxu1 %v5452_v0 }
 0x91d   : > { %4702 = vmatpush3.msra.mxu1 %v2412_v8 }
 0x91e   : > { %4703 = vmatprep.subr.mxu1 %v5452_v0 }
 0x91f   : > { %4704 = vmatpush3.msra.mxu1 %v2411_v10 }
 0x920   : > { %4705 = vmatprep.subr.mxu1 %v5452_v0 }
 0x921   : > { %4706 = vmatpush3.msra.mxu1 %v2410_v12 }
 0x922   : > { %4707 = vmatprep.subr.mxu1 %v5452_v0 }
 0x923   : > { %4708 = vmatpush3.msra.mxu1 %v2409_v13  ;;  %v3044_v13 = vld [vmem:[#allocation11 + $0x18] sm:$0xff] }
 0x924   : > { %4709 = vmatprep.subr.mxu1 %v5452_v0 }
 0x925   : > { %4710 = vmatpush3.msra.mxu1 %v2408_v15 }
 0x926   : > { %4711 = vmatprep.subr.mxu1 %v5452_v0 }
 0x927   : > { %4712 = vmatpush3.msra.mxu1 %v2407_v16 }
 0x928   : > { %4713 = vmatprep.subr.mxu1 %v5452_v0 }
 0x929   : > { %4714 = vmatpush3.msra.mxu1 %v2406_v5 }
 0x92a   : > { %4715 = vmatprep.subr.mxu1 %v5452_v0 }
 0x92b   : > { %4716 = vmatpush3.msra.mxu1 %v2405_v17 }
 0x92c   : > { %4717 = vmatprep.subr.mxu1 %v5452_v0 }
 0x92d   : > { %4718 = vmatpush3.msra.mxu1 %v2404_v18  ;;  %v2875_v18 = vld [vmem:[#allocation11 + $0x8] sm:$0xff] }
 0x92e   : > { %4719 = vmatprep.subr.mxu1 %v5452_v0 }
 0x92f   : > { %4720 = vmatpush3.msra.mxu1 %v2403_v19  ;;  %v2874_v19 = vld [vmem:[#allocation11] sm:$0xff] }
 0x930   : > { %4721 = vmatprep.subr.mxu1 %v5452_v0 }
 0x931   : > { %4722 = vmatpush3.msra.mxu1 %v2402_v26  ;;  %v3272_v26 = vld [vmem:[#allocation14 + $0x10] sm:$0xff] }
 0x932   : > { %4723 = vmatprep.subr.mxu1 %v5452_v0 }
 0x933   : > { %4724 = vmatpush3.msra.mxu1 %v2401_v27  ;;  %v3271_v27 = vld [vmem:[#allocation14 + $0x8] sm:$0xff] }
 0x934   : > { %4766 = vmatprep.subr.mxu1 %v5452_v0 }
 0x986   : > { %v2170_v59 = vpop.f32.mrf.mxu0 }
 0x987   : > { %4673 = vmatmul.mubr.msk.f32.vlgmr.msra.gmra.mxu0 %vm1112_vm2, %v2170_v59 }
 0x988   : > { %v4667_v60 = vpop.f32.mrf.mxu0  ;;  %4683 = vmatpush3.msra.mxu0 %v2326_v58  ;;  %4690 = vmatprep.mubr.msk.f32.mxu0 %vm5453_vm0, %v5452_v0 }
 0x989   : > { %4684 = vmatprep.subr.mxu0 %v5452_v0 }
 0x98a   : > { %4685 = vmatpush3.msra.mxu0 %v2325_v63 }
 0x98b   : > { %4686 = vmatprep.subr.mxu0 %v5452_v0 }
 0x98c   : > { %4687 = vmatpush3.msra.mxu0 %v2324_v1 }
 0x98d   : > { %4688 = vmatprep.subr.mxu0 %v5452_v0 }
 0x98e   : > { %4689 = vmatpush3.msra.mxu0 %v2323_v2 }
 0x98f   : > { %4728 = vmatprep.subr.mxu0 %v5452_v0 }
 0x9d4   : > { %v2318_v9 = vpop.f32.mrf.mxu1 }
 0x9d6   : > { %v4681_v11 = vpop.f32.mrf.mxu1 }
 0xa47   : > { %v2245_v20 = vpop.f32.mrf.mxu0 }
 0xa48   : > { %v2319_v21 = vadd.f32 %v2318_v9, %v2245_v20  ;;  %v3043_v20 = vld [vmem:[#allocation11 + $0x10] sm:$0xff] }
 0xa49   : > { %v4674_v22 = vpop.f32.mrf.mxu0 }
 0xa4a   : > { %v2322_v23 = vadd.f32 %v2319_v21, %v5988_v14  ;;  %v2488_v14 = vld [vmem:[#allocation7 + $0x8] sm:$0xff] }
 0xa4c   : > { %4691 = vmatmul.mubr.msk.f32.vlgmr.msra.gmra.mxu0 %vm889_vm1, %v2322_v23 }
 0xa4d   : > { %4736 = vmatprep.mubr.msk.f32.mxu0 %vm5453_vm0, %v5452_v0  ;;  %4729 = vmatpush3.msra.mxu0 %v2490_v28  ;;  %v3270_v28 = vld [vmem:[#allocation14] sm:$0xff] }
 0xa4e   : > { %4730 = vmatprep.subr.mxu0 %v5452_v0 }
 0xa4f   : > { %4731 = vmatpush3.msra.mxu0 %v2489_v29  ;;  %v3195_v29 = vld [vmem:[#allocation13 + $0x18] sm:$0xff] }
 0xa50   : > { %4732 = vmatprep.subr.mxu0 %v5452_v0 }
 0xa51   : > { %4733 = vmatpush3.msra.mxu0 %v2488_v14 }
 0xa52   : > { %4734 = vmatprep.subr.mxu0 %v5452_v0 }
 0xa53   : > { %4735 = vmatpush3.msra.mxu0 %v2487_v33  ;;  %v3192_v33 = vld [vmem:[#allocation13] sm:$0xff] }
 0xa54   : > { %4739 = vmatprep.subr.mxu0 %v5452_v0 }
 0xb0c   : > { %v2396_v30 = vpop.f32.mrf.mxu0 }
 0xb0d   : > { %v2400_v31 = vmax.f32 %v2396_v30, 0.0 }
 0xb0e   : > { %v4692_v32 = vpop.f32.mrf.mxu0 }
 0xb0f   : > { %4726 = vmatmul.mubr.f32.vlgmr.msra.gmra.mxu1 %v2400_v31  ;;  %v3194_v31 = vld [vmem:[#allocation13 + $0x10] sm:$0xff]  ;;  %v3193_v32 = vld [vmem:[#allocation13 + $0x8] sm:$0xff] }
 0xb10   : > { %4768 = vmatprep.mubr.msk.f32.mxu1 %vm5453_vm0, %v5452_v0 }
 0xbcf   : > { %v2483_v34 = vpop.f32.mrf.mxu1 }
 0xbd0   : > { %v6138_v35 = vadd.f32 %v2483_v34, %v2322_v23  ;;  %v3273_v23 = vld [vmem:[#allocation14 + $0x18] sm:$0xff] }
 0xbd1   : > { %v4727_v37 = vpop.f32.mrf.mxu1 }
 0xbd2   : > { %4737 = vmatmul.mubr.msk.f32.vlgmr.msra.gmra.mxu0 %vm889_vm1, %v6138_v35 }
 0xbd3   : > { %4740 = vmatpush3.msra.mxu0 %v2568_v36  ;;  %4747 = vmatprep.mubr.msk.f32.mxu0 %vm5453_vm0, %v5452_v0 }
 0xbd4   : > { %4741 = vmatprep.subr.mxu0 %v5452_v0 }
 0xbd5   : > { %4742 = vmatpush3.msra.mxu0 %v2567_v38 }
 0xbd6   : > { %4743 = vmatprep.subr.mxu0 %v5452_v0 }
 0xbd7   : > { %4744 = vmatpush3.msra.mxu0 %v2566_v39 }
 0xbd8   : > { %4745 = vmatprep.subr.mxu0 %v5452_v0 }
 0xbd9   : > { %4746 = vmatpush3.msra.mxu0 %v2565_v40 }
 0xbda   : > { %4748 = vmatmul.mubr.msk.f32.vlgmr.msra.gmra.mxu0 %vm889_vm1, %v6138_v35  ;;  %4750 = vmatprep.subr.mxu0 %v5452_v0 }
 0xbdb   : > { %4751 = vmatpush3.msra.mxu0 %v2642_v41  ;;  %4758 = vmatprep.mubr.msk.f32.mxu0 %vm5453_vm0, %v5452_v0 }
 0xbdc   : > { %4752 = vmatprep.subr.mxu0 %v5452_v0 }
 0xbdd   : > { %4753 = vmatpush3.msra.mxu0 %v2641_v42 }
 0xbde   : > { %4754 = vmatprep.subr.mxu0 %v5452_v0 }
 0xbdf   : > { %4755 = vmatpush3.msra.mxu0 %v2640_v43 }
 0xbe0   : > { %4756 = vmatprep.subr.mxu0 %v5452_v0 }
 0xbe1   : > { %4757 = vmatpush3.msra.mxu0 %v2639_v44 }
 0xbe2   : > { %4759 = vmatmul.mubr.msk.f32.vlgmr.msra.gmra.mxu0 %vm889_vm1, %v6138_v35  ;;  %4761 = vmatprep.subr.mxu0 %v5452_v0 }
 0xbe3   : > { %4763 = vmatprep.mubr.msk.f32.mxu0 %vm5453_vm0, %v5452_v0 }
 0xc92   : > { %v2560_v45 = vpop.f32.mrf.mxu0 }
 0xc93   : > { %v2564_v46 = vmul.f32 0.25, %v2560_v45 }
 0xc94   : > { %v4738_v47 = vpop.f32.mrf.mxu0 }
 0xc95   : > { %2876 = vrot.lane.b32.xlu1 %v2564_v46, %s6483_s0  ;;  %v3351_v47 = vld [vmem:[%s6403_s18 + $0x10] sm:$0xff] }
 0xc9a   : > { %v2635_v48 = vpop.f32.mrf.mxu0 }
 0xc9b   : > { %2878 = vrot.lane.b32.xlu0 %v2635_v48, %s6483_s0  ;;  %4762 = vmatpush3.xpose.msk.msra.mxu0 %vm1112_vm2, %v2635_v48  ;;  %v3350_v48 = vld [vmem:[%s6403_s18 + $0x8] sm:$0xff] }
 0xc9c   : > { %v4749_v49 = vpop.f32.mrf.mxu0  ;;  %4771 = vmatprep.subr.mxu0 %v5452_v0 }
 0xc9d   : > { %v3349_v49 = vld [vmem:[%s6403_s18] sm:$0xff] }
 0xc9e   : > { %4764 = vmatmul.mubr.msk.f32.vlgmr.msra.gmra.mxu0 %vm1112_vm2, %v2564_v46 }
 0xc9f   : > { %4773 = vmatprep.mubr.msk.f32.mxu0 %vm5453_vm0, %v5452_v0 }
 0xca2   : > { %v2709_v50 = vpop.f32.mrf.mxu0 }
 0xca3   : > { %4767 = vmatpush3.msra.mxu1 %v2709_v50 }
 0xca4   : > { %v4760_v51 = vpop.f32.mrf.mxu0  ;;  %4776 = vmatprep.subr.mxu1 %v5452_v0 }
 0xd07   : > { %v2877_v53 = vpop.permute.xlu1 %2876 }
 0xd0d   : > { %v2879_v52 = vpop.permute.xlu0 %2878 }
 0xd0e   : > { %4772 = vmatpush3.xpose.msk.msra.mxu0 %vm1112_vm2, %v2879_v52 }
 0xd0f   : > { %4781 = vmatprep.subr.mxu0 %v5452_v0 }
 0xd11   : > { %4774 = vmatmul.mubr.msk.f32.vlgmr.msra.gmra.mxu0 %vm1112_vm2, %v2877_v53 }
 0xd12   : > { %4785 = vmatprep.mubr.msk.f32.mxu0 %vm5453_vm0, %v5452_v0  ;;  %4782 = vmatpush3.msra.mxu0 %v3044_v13 }
 0xd13   : > { %4783 = vmatprep.subr.mxu0 %v5452_v0 }
 0xd14   : > { %4784 = vmatpush3.msra.mxu0 %v3043_v20  ;;  %v3919_v20 = vld [vmem:[#allocation17 + $0x18] sm:$0xff] }
 0xd15   : > { %4795 = vmatprep.subr.mxu0 %v5452_v0 }
 0xd5e   : > { %v2785_v54 = vpop.f32.mrf.mxu0 }
 0xd5f   : > { %v2789_v55 = vsel %vm884_vm3, -3.4028235e+38, %v2785_v54 }
 0xd60   : > { %v4765_v56 = vpop.f32.mrf.mxu0  ;;  %v2790_v57 = vsel %vm1190_vm4, %v2789_v55, -inf }
 0xd61   : > { %2791 = vmax.xlane.f32.xlu0 %v2790_v57 }
 0xdd1   : > { %v2950_v58 = vpop.f32.mrf.mxu0 }
 0xdd2   : > { %v2954_v59 = vsel %vm884_vm3, -3.4028235e+38, %v2950_v58 }
 0xdd3   : > { %v4775_v60 = vpop.f32.mrf.mxu0  ;;  %v2955_v63 = vsel %vm1190_vm4, %v2954_v59, -inf }
 0xdd4   : > { %2956 = vmax.xlane.f32.xlu1 %v2955_v63 }
 0xdea   : > { %v2792_v1 = vpop.xlane.xlu0 %2791 }
 0xdeb   : > { %v2793_v2 = vsub.f32 %v2789_v55, %v2792_v1 }
 0xded   : > { %v2794_v3 = vmul.f32 1.442695, %v2793_v2 }
 0xdef   : > { %5074 = vpow2.f32 %v2794_v3 }
 0xdfc   : > { %v5075_v4 = vpop.eup %5074 }
 0xdfd   : > { %v2796_v6 = vsel %vm1190_vm4, %v5075_v4, 0.0 }
 0xdfe   : > { %2797 = vadd.xlane.f32.xlu0 %v2796_v6 }
 0xe5d   : > { %v2957_v7 = vpop.xlane.xlu1 %2956 }
 0xe5e   : > { %v2958_v8 = vsub.f32 %v2954_v59, %v2957_v7 }
 0xe60   : > { %v2959_v9 = vmul.f32 1.442695, %v2958_v8 }
 0xe62   : > { %5076 = vpow2.f32 %v2959_v9  ;;  %v3592_v9 = vld [vmem:[#allocation16 + $0x8] sm:$0xff] }
 0xe6f   : > { %v5077_v10 = vpop.eup %5076 }
 0xe70   : > { %v2961_v24 = vsel %vm1190_vm4, %v5077_v10, 0.0 }
 0xe71   : > { %2962 = vadd.xlane.f32.xlu0 %v2961_v24 }
 0xe87   : > { %v2798_v25 = vpop.xlane.xlu0 %2797  ;;  %2967 = vrot.lane.b32.xlu0 %v2709_v50, %s6483_s0 }
 0xe88   : > { %5078 = vrcp.f32 %v2798_v25 }
 0xe95   : > { %v5079_v11 = vpop.eup %5078 }
 0xe96   : > { %v2800_v12 = vmul.f32 %v5079_v11, %v5075_v4  ;;  %v3591_v11 = vld [vmem:[#allocation16] sm:$0xff] }
 0xe98   : > { %4769 = vmatmul.mubr.msk.f32.vlgmr.msra.gmra.mxu1 %vm1190_vm4, %v2800_v12 }
 0xe99   : > { %4778 = vmatprep.mubr.msk.f32.mxu1 %vm5453_vm0, %v5452_v0 }
 0xefa   : > { %v2963_v15 = vpop.xlane.xlu0 %2962 }
 0xefb   : > { %5080 = vrcp.f32 %v2963_v15 }
 0xefe   : > { %v2968_v16 = vpop.permute.xlu0 %2967 }
 0xeff   : > { %4777 = vmatpush3.msra.mxu1 %v2968_v16 }
 0xf00   : > { %4788 = vmatprep.subr.mxu1 %v5452_v0 }
 0xf08   : > { %v5081_v5 = vpop.eup %5080 }
 0xf09   : > { %v2965_v17 = vmul.f32 %v5081_v5, %v5077_v10  ;;  %v3768_v5 = vld [vmem:[#allocation16 + $0x18] sm:$0xff] }
 0xf0b   : > { %4779 = vmatmul.mubr.msk.f32.vlgmr.msra.gmra.mxu1 %vm1190_vm4, %v2965_v17  ;;  %v3767_v17 = vld [vmem:[#allocation16 + $0x10] sm:$0xff] }
 0xf0c   : > { %4789 = vmatpush3.msra.mxu1 %v2875_v18  ;;  %4792 = vmatprep.mubr.msk.f32.mxu1 %vm5453_vm0, %v5452_v0 }
 0xf0d   : > { %4790 = vmatprep.subr.mxu1 %v5452_v0 }
 0xf0e   : > { %4791 = vmatpush3.msra.mxu1 %v2874_v19 }
 0xf0f   : > { %4806 = vmatprep.subr.mxu1 %v3273_v23 }
 0xf58   : > { %v2870_v21 = vpop.f32.mrf.mxu1 }
 0xf59   : > { %4793 = vmatmul.mubr.msk.f32.vlgmr.msra.gmra.mxu1 %vm1112_vm2, %v2870_v21 }
 0xf5a   : > { %v4770_v22 = vpop.f32.mrf.mxu1  ;;  %4814 = vmatprep.mubr.msk.f32.mxu1 %vm889_vm1, %v5952_v61  ;;  %4807 = vmatpush3.msra.mxu1 %v3273_v23  ;;  %v3918_v23 = vld [vmem:[#allocation17 + $0x10] sm:$0xff] }
 0xf5b   : > { %4808 = vmatprep.subr.mxu1 %v3272_v26 }
 0xf5c   : > { %4809 = vmatpush3.msra.mxu1 %v3272_v26  ;;  %v3917_v26 = vld [vmem:[#allocation17 + $0x8] sm:$0xff] }
 0xf5d   : > { %4810 = vmatprep.subr.mxu1 %v3271_v27 }
 0xf5e   : > { %4811 = vmatpush3.msra.mxu1 %v3271_v27  ;;  %v3916_v27 = vld [vmem:[#allocation17] sm:$0xff] }
 0xf5f   : > { %4812 = vmatprep.subr.mxu1 %v3270_v28 }
 0xf60   : > { %4813 = vmatpush3.msra.mxu1 %v3270_v28  ;;  %v4009_v28 = vld [vmem:[%s6406_s21 + $0x78] sm:$0xff] }
 0xf61   : > { %4815 = vmatmul.mubr.msk.f32.vlgmr.msra.gmra.mxu1 %vm889_vm1, %v5954_v62  ;;  %4828 = vmatprep.subr.mxu1 %v5452_v0 }
 0xf62   : > { %4832 = vmatprep.mubr.msk.f32.mxu1 %vm5453_vm0, %v5452_v0 }
 0xfcb   : > { %v3039_v14 = vpop.f32.mrf.mxu1 }
 0xfcc   : > { %4786 = vmatmul.mubr.msk.f32.vlgmr.msra.gmra.mxu0 %vm1112_vm2, %v3039_v14  ;;  %v4007_v14 = vld [vmem:[%s6406_s21 + $0x68] sm:$0xff] }
 0xfcd   : > { %v4780_v30 = vpop.f32.mrf.mxu1  ;;  %4796 = vmatpush3.msra.mxu0 %v3195_v29  ;;  %4803 = vmatprep.mubr.msk.f32.mxu0 %vm5453_vm0, %v5452_v0  ;;  %v4008_v29 = vld [vmem:[%s6406_s21 + $0x70] sm:$0xff] }
 0xfce   : > { %4797 = vmatprep.subr.mxu0 %v5452_v0  ;;  %v4006_v30 = vld [vmem:[%s6406_s21 + $0x60] sm:$0xff] }
 0xfcf   : > { %4798 = vmatpush3.msra.mxu0 %v3194_v31  ;;  %v4005_v31 = vld [vmem:[%s6406_s21 + $0x58] sm:$0xff] }
 0xfd0   : > { %4799 = vmatprep.subr.mxu0 %v5452_v0 }
 0xfd1   : > { %4800 = vmatpush3.msra.mxu0 %v3193_v32 }
 0xfd2   : > { %4801 = vmatprep.subr.mxu0 %v5452_v0 }
 0xfd3   : > { %4802 = vmatpush3.msra.mxu0 %v3192_v33  ;;  %v4004_v33 = vld [vmem:[%s6406_s21 + $0x50] sm:$0xff] }
0x1019   : > { %v3187_v34 = vpop.f32.mrf.mxu1 }
0x101b   : > { %v4794_v36 = vpop.f32.mrf.mxu1 }
0x101c   : > { %v4003_v36 = vld [vmem:[%s6406_s21 + $0x48] sm:$0xff] }
0x1021   : > { %v4816_v37 = vpop.f32.mrf.mxu1 }
0x1022   : > { %3597 = vrot.lane.b32.xlu1 %v4816_v37, %s6483_s0  ;;  %4829 = vmatpush3.xpose.msk.msra.mxu1 %vm1112_vm2, %v4816_v37  ;;  %v4002_v37 = vld [vmem:[%s6406_s21 + $0x40] sm:$0xff] }
0x1023   : > { %v3340_v38 = vpop.f32.mrf.mxu1  ;;  %4830 = vmatprep.subr.mxu1 %v5452_v0 }
0x1024   : > { %3595 = vrot.lane.b32.xlu0 %v3340_v38, %s6483_s0 }
0x1026   : > { %4831 = vmatpush3.xpose.msk.msra.mxu1 %vm1112_vm2, %v3340_v38  ;;  %v4001_v38 = vld [vmem:[%s6406_s21 + $0x38] sm:$0xff] }
0x1027   : > { %4842 = vmatprep.subr.mxu1 %v5452_v0 }
0x108c   : > { %v3114_v39 = vpop.f32.mrf.mxu0 }
0x108d   : > { %v3188_v40 = vadd.f32 %v3187_v34, %v3114_v39  ;;  %v4000_v39 = vld [vmem:[%s6406_s21 + $0x30] sm:$0xff] }
0x108e   : > { %v4787_v41 = vpop.f32.mrf.mxu0 }
0x108f   : > { %v6215_v42 = vadd.f32 %v3188_v40, %v6138_v35  ;;  %v3999_v40 = vld [vmem:[%s6406_s21 + $0x28] sm:$0xff]  ;;  %v3998_v41 = vld [vmem:[%s6406_s21 + $0x20] sm:$0xff] }
0x1091   : > { %4804 = vmatmul.mubr.msk.f32.vlgmr.msra.gmra.mxu0 %vm889_vm1, %v6215_v42 }
0x1092   : > { %4825 = vmatprep.mubr.msk.f32.mxu0 %vm889_vm1, %v5952_v61  ;;  %v3352_v61 = vld [vmem:[%s6403_s18 + $0x18] sm:$0xff] }
0x1093   : > { %4817 = vmatprep.subr.mxu0 %v3352_v61 }
0x1094   : > { %v3598_v45 = vpop.permute.xlu1 %3597  ;;  %4818 = vmatpush3.msra.mxu0 %v3352_v61 }
0x1095   : > { %4819 = vmatprep.subr.mxu0 %v3351_v47 }
0x1096   : > { %v3596_v35 = vpop.permute.xlu0 %3595  ;;  %4820 = vmatpush3.msra.mxu0 %v3351_v47  ;;  %v3995_v47 = vld [vmem:[%s6406_s21 + $0x8] sm:$0xff] }
0x1097   : > { %4821 = vmatprep.subr.mxu0 %v3350_v48 }
0x1098   : > { %4822 = vmatpush3.msra.mxu0 %v3350_v48  ;;  %v3994_v48 = vld [vmem:[%s6406_s21] sm:$0xff] }
0x1099   : > { %4823 = vmatprep.subr.mxu0 %v3349_v49 }
0x109a   : > { %4824 = vmatpush3.msra.mxu0 %v3349_v49 }
0x109b   : > { %4826 = vmatmul.mubr.msk.f32.vlgmr.msra.gmra.mxu0 %vm889_vm1, %v5954_v62  ;;  %4835 = vmatprep.subr.mxu0 %v5452_v0 }
0x109c   : > { %4839 = vmatprep.mubr.msk.f32.mxu0 %vm5453_vm0, %v5452_v0 }
0x1151   : > { %v3265_v43 = vpop.f32.mrf.mxu0 }
0x1152   : > { %v3269_v44 = vmul.f32 0.25, %v3265_v43  ;;  %v3997_v43 = vld [vmem:[%s6406_s21 + $0x18] sm:$0xff] }
0x1153   : > { %v4805_v46 = vpop.f32.mrf.mxu0 }
0x1154   : > { %3593 = vrot.lane.b32.xlu0 %v3269_v44, %s6483_s0  ;;  %4833 = vmatmul.mubr.msk.f32.vlgmr.msra.gmra.mxu1 %vm1112_vm2, %v3269_v44  ;;  %v3996_v44 = vld [vmem:[%s6406_s21 + $0x10] sm:$0xff] }
0x1155   : > { %4843 = vmatpush3.xpose.msk.msra.mxu1 %vm1112_vm2, %v3598_v45  ;;  %4846 = vmatprep.mubr.msk.f32.mxu1 %vm5453_vm0, %v5452_v0 }
0x1156   : > { %4844 = vmatprep.subr.mxu1 %v5452_v0 }
0x1159   : > { %4845 = vmatpush3.xpose.msk.msra.mxu1 %vm1112_vm2, %v3596_v35 }
0x115a   : > { %4863 = vmatprep.subr.mxu1 %v5452_v0 }
0x115b   : > { %v4827_v63 = vpop.f32.mrf.mxu0 }
0x115c   : > { %4836 = vmatpush3.msra.mxu0 %v4827_v63 }
0x115d   : > { %v3419_v1 = vpop.f32.mrf.mxu0  ;;  %4837 = vmatprep.subr.mxu0 %v5452_v0 }
0x115e   : > { %4838 = vmatpush3.msra.mxu0 %v3419_v1 }
0x115f   : > { %4849 = vmatprep.subr.mxu0 %v5452_v0 }
0x11c6   : > { %v3594_v50 = vpop.permute.xlu0 %3593 }
0x11c7   : > { %4847 = vmatmul.mubr.msk.f32.vlgmr.msra.gmra.mxu1 %vm1112_vm2, %v3594_v50 }
0x11c8   : > { %4867 = vmatprep.mubr.msk.f32.mxu1 %vm5453_vm0, %v5452_v0  ;;  %4864 = vmatpush3.msra.mxu1 %v3592_v9 }
0x11c9   : > { %4865 = vmatprep.subr.mxu1 %v5452_v0 }
0x11ca   : > { %4866 = vmatpush3.msra.mxu1 %v3591_v11 }
0x11cb   : > { %4881 = vmatprep.subr.mxu1 %v5452_v0 }
0x1214   : > { %v3503_v51 = vpop.f32.mrf.mxu1 }
0x1215   : > { %v3507_v52 = vsel %vm1112_vm2, %v3503_v51, -inf }
0x1216   : > { %3508 = vmax.xlane.f32.xlu1 %v3507_v52  ;;  %v4834_v53 = vpop.f32.mrf.mxu1 }
0x1287   : > { %v3671_v54 = vpop.f32.mrf.mxu1 }
0x1288   : > { %v3675_v55 = vsel %vm1112_vm2, %v3671_v54, -inf }
0x1289   : > { %3676 = vmax.xlane.f32.xlu0 %v3675_v55  ;;  %v4848_v62 = vpop.f32.mrf.mxu1 }
0x129f   : > { %v3509_v56 = vpop.xlane.xlu1 %3508 }
0x12a0   : > { %v3510_v57 = vsub.f32 %v3503_v51, %v3509_v56 }
0x12a2   : > { %v3511_v58 = vmul.f32 1.442695, %v3510_v57 }
0x12a4   : > { %5082 = vpow2.f32 %v3511_v58  ;;  %v4362_v58 = vld [vmem:[%s6484_s22] ss:$0 sm:$0xff] }
0x12b1   : > { %v5083_v59 = vpop.eup %5082 }
0x12b2   : > { %v3513_v60 = vsel %vm1112_vm2, %v5083_v59, 0.0 }
0x12b3   : > { %3514 = vadd.xlane.f32.xlu0 %v3513_v60 }
0x12c9   : > { %3690 = vrot.lane.b32.xlu0 %v4827_v63, %s6483_s0 }
0x1312   : > { %v3677_v2 = vpop.xlane.xlu0 %3676 }
0x1313   : > { %v3678_v3 = vsub.f32 %v3671_v54, %v3677_v2 }
0x1315   : > { %v3679_v4 = vmul.f32 1.442695, %v3678_v3 }
0x1317   : > { %5084 = vpow2.f32 %v3679_v4 }
0x1324   : > { %v5085_v6 = vpop.eup %5084 }
0x1325   : > { %v3681_v7 = vsel %vm1112_vm2, %v5085_v6, 0.0 }
0x1326   : > { %3682 = vadd.xlane.f32.xlu1 %v3681_v7 }
0x1337   : > { %3688 = vrot.lane.b32.xlu1 %v3419_v1, %s6483_s0  ;;  %s6485_s0 = sshll.u32 %s5784_s16, 3 }
0x1338   : > { %s871_s17 = scalar_lea.vmem [#allocation19], %s6485_s0 }
0x1339   : > { %s4112_s15 = sshll.u32 %s871_s17, 4  ;;  %s4113_s15 = int_to_ptr.vmem [resolvable:$true] %s4112_s15 }
0x133a   : > { %s5354_s7 = scalar_lea.vmem %s4113_s15, 128  ;;  %p5361_p4 = scmp.lt.s32.totalorder %s4113_s15, %s5359_s26 }
0x133b   : > { %p5355_p9 = scmp.ne.s32.totalorder %s4113_s15, %s5354_s7  ;;  %p5362_p0 = scmp.lt.s32.totalorder %s5360_s20, %s5354_s7 }
0x133c   : > { %v3515_v8 = vpop.xlane.xlu0 %3514 }
0x133d   : > { %5086 = vrcp.f32 %v3515_v8  ;;  %p5356_p1 = pnand %p5355_p9, %p6487_p11  ;;  %p5363_p6 = por %p5362_p0, %p5361_p4 }
0x133f   : > { %p5357_p3 = pneg %p5356_p1 }
0x1340   : > { %v3691_v25 = vpop.permute.xlu0 %3690 }
0x1341   : > { %p5364_p5 = pnand %p5363_p6, %p5357_p3 }
0x134a   : > { %v5087_v10 = vpop.eup %5086 }
0x134b   : > { %v3517_v24 = vmul.f32 %v5087_v10, %v5083_v59 }
0x134d   : > { %4840 = vmatmul.mubr.msk.f32.vlgmr.msra.gmra.mxu0 %vm1112_vm2, %v3517_v24 }
0x134e   : > { %4850 = vmatpush3.msra.mxu0 %v3691_v25  ;;  %4853 = vmatprep.mubr.msk.f32.mxu0 %vm5453_vm0, %v5452_v0 }
0x134f   : > { %4851 = vmatprep.subr.mxu0 %v5452_v0 }
0x13af   : > { %v3683_v12 = vpop.xlane.xlu1 %3682 }
0x13b0   : > { %5088 = vrcp.f32 %v3683_v12 }
0x13b3   : > { %v3689_v13 = vpop.permute.xlu1 %3688 }
0x13b4   : > { %4852 = vmatpush3.msra.mxu0 %v3689_v13 }
0x13b5   : > { %4856 = vmatprep.subr.mxu0 %v5452_v0 }
0x13bd   : > { %v5089_v15 = vpop.eup %5088 }
0x13be   : > { %v3685_v16 = vmul.f32 %v5089_v15, %v5085_v6 }
0x13c0   : > { %4854 = vmatmul.mubr.msk.f32.vlgmr.msra.gmra.mxu0 %vm1112_vm2, %v3685_v16 }
0x13c1   : > { %4857 = vmatpush3.msra.mxu0 %v3768_v5  ;;  %4860 = vmatprep.mubr.msk.f32.mxu0 %vm5453_vm0, %v5452_v0 }
0x13c2   : > { %4858 = vmatprep.subr.mxu0 %v5452_v0 }
0x13c3   : > { %4859 = vmatpush3.msra.mxu0 %v3767_v17 }
0x13c4   : > { %4870 = vmatprep.subr.mxu0 %v5452_v0 }
0x140d   : > { %v3587_v18 = vpop.f32.mrf.mxu0 }
0x140e   : > { %4868 = vmatmul.mubr.msk.f32.vlgmr.msra.gmra.mxu1 %vm1112_vm2, %v3587_v18 }
0x140f   : > { %v4841_v19 = vpop.f32.mrf.mxu0  ;;  %4913 = vmatprep.mubr.msk.f32.mxu1 %vm5453_vm0, %v5452_v0  ;;  %4882 = vmatpush3.msra.mxu1 %v4009_v28 }
0x1410   : > { %4883 = vmatprep.subr.mxu1 %v5452_v0 }
0x1411   : > { %4884 = vmatpush3.msra.mxu1 %v4008_v29 }
0x1412   : > { %4885 = vmatprep.subr.mxu1 %v5452_v0 }
0x1413   : > { %4886 = vmatpush3.msra.mxu1 %v4007_v14 }
0x1414   : > { %4887 = vmatprep.subr.mxu1 %v5452_v0 }
0x1415   : > { %4888 = vmatpush3.msra.mxu1 %v4006_v30 }
0x1416   : > { %4889 = vmatprep.subr.mxu1 %v5452_v0 }
0x1417   : > { %4890 = vmatpush3.msra.mxu1 %v4005_v31 }
0x1418   : > { %4891 = vmatprep.subr.mxu1 %v5452_v0 }
0x1419   : > { %4892 = vmatpush3.msra.mxu1 %v4004_v33 }
0x141a   : > { %4893 = vmatprep.subr.mxu1 %v5452_v0 }
0x141b   : > { %4894 = vmatpush3.msra.mxu1 %v4003_v36 }
0x141c   : > { %4895 = vmatprep.subr.mxu1 %v5452_v0 }
0x141d   : > { %4896 = vmatpush3.msra.mxu1 %v4002_v37 }
0x141e   : > { %4897 = vmatprep.subr.mxu1 %v5452_v0 }
0x141f   : > { %4898 = vmatpush3.msra.mxu1 %v4001_v38 }
0x1420   : > { %4899 = vmatprep.subr.mxu1 %v5452_v0 }
0x1421   : > { %4900 = vmatpush3.msra.mxu1 %v4000_v39 }
0x1422   : > { %4901 = vmatprep.subr.mxu1 %v5452_v0 }
0x1423   : > { %4902 = vmatpush3.msra.mxu1 %v3999_v40 }
0x1424   : > { %4903 = vmatprep.subr.mxu1 %v5452_v0 }
0x1425   : > { %4904 = vmatpush3.msra.mxu1 %v3998_v41 }
0x1426   : > { %4905 = vmatprep.subr.mxu1 %v5452_v0 }
0x1427   : > { %4906 = vmatpush3.msra.mxu1 %v3997_v43 }
0x1428   : > { %4907 = vmatprep.subr.mxu1 %v5452_v0 }
0x1429   : > { %4908 = vmatpush3.msra.mxu1 %v3996_v44 }
0x142a   : > { %4909 = vmatprep.subr.mxu1 %v5452_v0 }
0x142b   : > { %4910 = vmatpush3.msra.mxu1 %v3995_v47 }
0x142c   : > { %4911 = vmatprep.subr.mxu1 %v5452_v0 }
0x142d   : > { %4912 = vmatpush3.msra.mxu1 %v3994_v48 }
0x1480   : > { %v3763_v21 = vpop.f32.mrf.mxu0 }
0x1481   : > { %4861 = vmatmul.mubr.msk.f32.vlgmr.msra.gmra.mxu0 %vm1112_vm2, %v3763_v21 }
0x1482   : > { %v4855_v22 = vpop.f32.mrf.mxu0  ;;  %4871 = vmatpush3.msra.mxu0 %v3919_v20  ;;  %4878 = vmatprep.mubr.msk.f32.mxu0 %vm5453_vm0, %v5452_v0 }
0x1483   : > { %4872 = vmatprep.subr.mxu0 %v5452_v0 }
0x1484   : > { %4873 = vmatpush3.msra.mxu0 %v3918_v23 }
0x1485   : > { %4874 = vmatprep.subr.mxu0 %v5452_v0 }
0x1486   : > { %4875 = vmatpush3.msra.mxu0 %v3917_v26 }
0x1487   : > { %4876 = vmatprep.subr.mxu0 %v5452_v0 }
0x1488   : > { %4877 = vmatpush3.msra.mxu0 %v3916_v27 }
0x14ce   : > { %v3911_v32 = vpop.f32.mrf.mxu1 }
0x14d0   : > { %v4869_v34 = vpop.f32.mrf.mxu1 }
0x1541   : > { %v3838_v45 = vpop.f32.mrf.mxu0 }
0x1542   : > { %v3912_v46 = vadd.f32 %v3911_v32, %v3838_v45 }
0x1543   : > { %v4862_v35 = vpop.f32.mrf.mxu0 }
0x1544   : > { %v3915_v61 = vadd.f32 %v3912_v46, %v6215_v42 }
0x1546   : > { %4879 = vmatmul.mubr.msk.f32.vlgmr.msra.gmra.mxu0 %vm889_vm1, %v3915_v61 }
0x1606   : > { %v3989_v49 = vpop.f32.mrf.mxu0 }
0x1607   : > { %v3993_v50 = vmax.f32 %v3989_v49, 0.0 }
0x1608   : > { %v4880_v51 = vpop.f32.mrf.mxu0 }
0x1609   : > { %4914 = vmatmul.mubr.f32.vlgmr.msra.gmra.mxu1 %v3993_v50 }
0x16c9   : > { %v4076_v42 = vpop.f32.mrf.mxu1 }
0x16ca   : > { %v4077_v52 = vadd.f32 %v4076_v42, %v3915_v61 }
0x16cb   : > { %v4915_v53 = vpop.f32.mrf.mxu1 }
0x16cc   : > { %v4080_v54 = vmul.f32 %v4077_v52, %v4077_v52 }
0x16ce   : > { %v4081_v55 = vsel %vm889_vm1, %v4080_v54, 0.0 }
0x16cf   : > { %4082 = vadd.xlane.f32.xlu1 %v4081_v55 }
0x1758   : > { %v4083_v0 = vpop.xlane.xlu1 %4082 }
0x1759   : > { %v4085_v62 = vmul.f32 0.03125, %v4083_v0 }
0x175b   : > { %v4087_v56 = vadd.f32 1e-06, %v4085_v62 }
0x175d   : > { %5090 = vrsqrt.f32 %v4087_v56 }
0x176a   : > { %v5091_v57 = vpop.eup %5090 }
0x176b   : > { %v4089_v59 = vmul.f32 %v5091_v57, %v4077_v52 }
0x176d   : > { %v4096_v60 = vmul.f32 %v4362_v58, %v4089_v59 }
0x176f   : > { %4097 = vst.msk [vmem:[%s871_s17] sm:$0xff] %vm889_vm1, %v4096_v60 }
0x1770   : > { %5367 = shalt.err (!%p5364_p5)
}
0x1771   : > { %s5368_s22 = scalar_lea.hbm %s4110_s2, 128  ;;  %s5372_s0 = scalar_lea.hbm %s6486_s1, 256 }
0x1772   : > { %p5369_p7 = scmp.ne.s32.totalorder %s4110_s2, %s5368_s22  ;;  %p5373_p2 = scmp.lt.s32.totalorder %s4110_s2, %s6486_s1 }
0x1773   : > { %p5374_p13 = scmp.lt.s32.totalorder %s5372_s0, %s5368_s22 }
0x1774   : > { %p5370_p10 = pnand %p5369_p7, %p6487_p11 }
0x1775   : > { %p5375_p8 = por %p5374_p13, %p5373_p2 }
0x1776   : > { %p5371_p12 = pneg %p5370_p10 }
0x1778   : > { %p5376_p9 = pnand %p5375_p8, %p5371_p12 }
0x177a   : > { %5379 = shalt.err (!%p5376_p9)
}
0x177b   : > { %4954 = dma.vmem_to_hbm [thread:$0]  (%p6487_p11), %s4113_s15, 128, %s4110_s2, %s4099_s6  }
0x177c PF: > { %s4124_s7 = sand.u32 1, %s5426_s4   ;;  %p6488_p1 = scmp.ne.s32.totalorder %s6461_s10, 0 }
0x177d   : > { %p6489_p3 = scmp.ge.s32.totalorder %s5438_s25, 2  ;;  %s4125_s19 = scalar_lea.sflag [#allocation4], %s4124_s7 }
0x177f   : > { %p4989_p4 = pnand %p6489_p3, %p6488_p1 }
0x1781   : > { %p4990_p0 = pneg %p4989_p4 }
0x1783   : > { %5421 = dma.done.wait (%p4990_p0), %s4125_s19, 128  }
0x1784   : > { %5423 = vsyncadd (%p4990_p0), %s4125_s19, 4294967168  ;;  %p41_p6 = scmp.ge.s32.totalorder %s5727_s3, 4   ;;  %s6490_s4 = smov %s5430_s30 }
0x1785   : > { %s6491_s30 = smov %s5434_s24  ;;  %s6492_s24 = smov %s5739_s28 }
0x1786   : > { %s6493_s25 = smov %s5727_s3  ;;  %43 = sbr.rel (!%p41_p6) target bundleno = 30 (0x1e), region = 196 }
0x178b   :  { %4130 = vsyncpa [#allocation3], 1 }
0x178c   :  { %4132 = vsyncpa [#allocation3 + $0x1], 1 }
0x178d   :  { %4133 = vsyncpa [#allocation6], 1 }
0x178e   :  { %4134 = vsyncpa [#allocation9], 1 }
0x178f   :  { %4135 = vsyncpa [#allocation12], 1 }
0x1790   :  { %4136 = vsyncpa [#allocation15], 1 }
0x1791   :  { %4137 = vsyncpa [#allocation18], 1 }
0x1792   :  { %4138 = vsyncpa [#allocation4], 1 }
0x1793   :  { %4140 = vsyncpa [#allocation4 + $0x1], 1 }

</bundles_post_ra>
